<compile_context>
chip_gen: v5e
topology: v5e:2x2
jax: 0.10.0
libtpu: 0.0.40
codegen_flags: <defaults>
</compile_context>

<pallas_src>
import functools

import jax
import jax.numpy as jnp
from jax.experimental import pallas as pl
from jax.experimental.pallas import tpu as pltpu


_HW_TILE_CAP = 16384     # max lanes per tile for the coil-stream kernels
_REG_TILE_CAP = 4096     # max lanes per tile for the sublane-dense reg kernel


def _vmem_limit_bytes() -> int:
    try:
        cap = int(pltpu.get_tpu_info().vmem_capacity_bytes)
    except Exception:
        cap = 64 << 20
    return min(48 << 20, (cap * 3) // 4)


_VMEM_LIMIT_BYTES = _vmem_limit_bytes()
_VMEM_BUDGET = max((_VMEM_LIMIT_BYTES * 4) // 5, 8 << 20)

_CPARAMS = pltpu.CompilerParams(
    dimension_semantics=("parallel", "parallel"),
    vmem_limit_bytes=_VMEM_LIMIT_BYTES)

_SMEM_SPEC = pl.BlockSpec(memory_space=pltpu.MemorySpace.SMEM)


def _pad8(n: int) -> int:
    return -(-n // 8) * 8


def _pick_tile(extent: int, bytes_per_lane: int, cap: int) -> int:
    """Largest lane-aligned (x128) divisor of `extent` that fits both `cap`
    lanes and the double-buffered VMEM budget.  Falls back to the full extent
    (always a legal block shape) when no suitable divisor exists."""
    budget_lanes = max(_VMEM_BUDGET // max(bytes_per_lane, 1), 128)
    limit = min(cap, budget_lanes)
    if extent <= limit:
        return extent
    best = 0
    t = (min(limit, extent) // 128) * 128
    while t >= 128:
        if extent % t == 0:
            best = t
            break
        t -= 128
    if best >= 1024:
        return best
    if extent <= budget_lanes:
        return extent            # avoid tiny (<1024 lane) tiles when full fits
    if best:
        return best
    # TODO(synk): pad the flattened spatial axis for ragged tiling when it has
    # no lane-aligned divisor and the full extent exceeds the VMEM budget.
    return extent


# ----------------------------------------------------------------------------
# FFT glue (plain JAX).  With the checkerboard twiddle (even H, W) these are
# plain uncentered transforms; the shift-based path is only the odd-dims
# fallback.
# TODO(synk): 2D FFT has no clean Pallas equivalent; kept as jnp.fft.
# ----------------------------------------------------------------------------
def _to_planar(x_c, B, C, HW):
    return jnp.real(x_c).reshape(B, C, HW), jnp.imag(x_c).reshape(B, C, HW)


def _ifft2_planar(k_re, k_im, spatial, use_shifts):
    B, C, H, W = spatial
    x = jax.lax.complex(k_re, k_im).reshape(B, C, H, W)
    if use_shifts:
        x = jnp.fft.ifftshift(x, axes=(-2, -1))
        x = jnp.fft.ifft2(x, norm="ortho")
        x = jnp.fft.fftshift(x, axes=(-2, -1))
    else:
        x = jnp.fft.ifft2(x, norm="ortho")
    return _to_planar(x, B, C, H * W)


def _fft2_planar(x_re, x_im, spatial, use_shifts):
    B, C, H, W = spatial
    x = jax.lax.complex(x_re, x_im).reshape(B, C, H, W)
    if use_shifts:
        x = jnp.fft.ifftshift(x, axes=(-2, -1))
        x = jnp.fft.fft2(x, norm="ortho")
        x = jnp.fft.fftshift(x, axes=(-2, -1))
    else:
        x = jnp.fft.fft2(x, norm="ortho")
    return _to_planar(x, B, C, H * W)


# ----------------------------------------------------------------------------
# Pallas kernel 1: sens_reduce combine: sum_c complex_mul(x, conj(sens))
# ----------------------------------------------------------------------------
def _coil_combine_kernel(xr_ref, xi_ref, sr_ref, si_ref, cr_ref, ci_ref):
    a_re, a_im = xr_ref[0], xi_ref[0]          # (C, T)
    s_re, s_im = sr_ref[0], si_ref[0]
    cr_ref[...] = jnp.sum(a_re * s_re + a_im * s_im, axis=0, keepdims=True)[None]
    ci_ref[...] = jnp.sum(a_im * s_re - a_re * s_im, axis=0, keepdims=True)[None]


def coil_combine(img_re, img_im, sens_re, sens_im):
    B, C, HW = img_re.shape
    bpl = 2 * 4 * (4 * _pad8(C) + 2 * 8)        # 2 buffers x f32 x sublanes
    t = _pick_tile(HW, bpl, _HW_TILE_CAP)
    coil_spec = pl.BlockSpec((1, C, t), lambda b, i: (b, 0, i))
    comb_spec = pl.BlockSpec((1, 1, t), lambda b, i: (b, 0, i))
    return pl.pallas_call(
        _coil_combine_kernel,
        grid=(B, pl.cdiv(HW, t)),
        out_shape=(jax.ShapeDtypeStruct((B, 1, HW), img_re.dtype),
                   jax.ShapeDtypeStruct((B, 1, HW), img_re.dtype)),
        in_specs=[coil_spec] * 4,
        out_specs=(comb_spec, comb_spec),
        compiler_params=_CPARAMS,
    )(img_re, img_im, sens_re, sens_im)


# ----------------------------------------------------------------------------
# Pallas kernel 2: fused regularizer + sens_expand multiply.
#   normalize -> 1x1 conv (2->chans) -> ReLU -> 1x1 conv (chans->2)
#   -> unnormalize -> complex_mul(., sens)
# The combined plane is presented sublane-dense as (R, T) (R = 8 normally) and
# the sens maps / outputs as (C, R, T) views so every vreg is fully occupied.
# TODO(synk): NormUnet (U-Net, chans=18, pools=4) source was not provided; this
#             keeps the normalize / regularize / unnormalize structure with a
#             1x1-conv MLP instead of the full U-Net.
# ----------------------------------------------------------------------------
def _reg_expand_kernel(stats_ref, w1_ref, b1_ref, w2_ref, b2_ref,
                       cr_ref, ci_ref, sr_ref, si_ref, or_ref, oi_ref):
    b = pl.program_id(0)
    chans = w1_ref.shape[1]
    C = sr_ref.shape[1]

    x_re = cr_ref[0]                            # (R, T)  sublane-dense
    x_im = ci_ref[0]

    mean_re, mean_im = stats_ref[b, 0], stats_ref[b, 1]
    inv_re, inv_im = stats_ref[b, 2], stats_ref[b, 3]
    std_re, std_im = stats_ref[b, 4], stats_ref[b, 5]

    xn_re = (x_re - mean_re) * inv_re
    xn_im = (x_im - mean_im) * inv_im

    # 1x1 "convs" as VPU broadcast MACs (scalar weights from SMEM); kept off
    # the MXU on purpose (K=2 / K=chans matmuls would be <4% MXU utilization).
    y_re = jnp.zeros_like(x_re)
    y_im = jnp.zeros_like(x_im)
    for c in range(chans):
        h = jnp.maximum(
            w1_ref[0, c] * xn_re + w1_ref[1, c] * xn_im + b1_ref[c], 0.0)
        y_re = y_re + w2_ref[c, 0] * h
        y_im = y_im + w2_ref[c, 1] * h
    y_re = (y_re + b2_ref[0]) * std_re + mean_re       # un-normalize
    y_im = (y_im + b2_ref[1]) * std_im + mean_im

    # sens_expand: hoist ONE explicit broadcast of the regularized image over
    # the coil axis, then the four products of the complex multiply.
    yb_re = jnp.broadcast_to(y_re[None], (C,) + y_re.shape)
    yb_im = jnp.broadcast_to(y_im[None], (C,) + y_im.shape)
    s_re, s_im = sr_ref[0], si_ref[0]           # (C, R, T)
    or_ref[...] = (yb_re * s_re - yb_im * s_im)[None]
    oi_ref[...] = (yb_re * s_im + yb_im * s_re)[None]


def reg_expand(comb_re, comb_im, stats, reg_params, sens_re, sens_im, R):
    B, C, HW = sens_re.shape
    hw_r = HW // R
    w1, b1, w2, b2 = reg_params

    # Free HBM reshapes (contiguous): (B,1,HW)->(B,R,HW/R), (B,C,HW)->(B,C,R,HW/R)
    c_re = comb_re.reshape(B, R, hw_r)
    c_im = comb_im.reshape(B, R, hw_r)
    s_re = sens_re.reshape(B, C, R, hw_r)
    s_im = sens_im.reshape(B, C, R, hw_r)

    bpl = 2 * 4 * (2 * 8 + 4 * C * 8)
    t = _pick_tile(hw_r, bpl, _REG_TILE_CAP)
    comb_spec = pl.BlockSpec((1, R, t), lambda b, i: (b, 0, i))
    coil_spec = pl.BlockSpec((1, C, R, t), lambda b, i: (b, 0, 0, i))
    out_re, out_im = pl.pallas_call(
        _reg_expand_kernel,
        grid=(B, pl.cdiv(hw_r, t)),
        out_shape=(jax.ShapeDtypeStruct((B, C, R, hw_r), comb_re.dtype),
                   jax.ShapeDtypeStruct((B, C, R, hw_r), comb_re.dtype)),
        in_specs=[_SMEM_SPEC] * 5 + [comb_spec, comb_spec, coil_spec, coil_spec],
        out_specs=(coil_spec, coil_spec),
        compiler_params=_CPARAMS,
    )(stats, w1, b1, w2, b2, c_re, c_im, s_re, s_im)
    return out_re.reshape(B, C, HW), out_im.reshape(B, C, HW)


# ----------------------------------------------------------------------------
# Pallas kernel 3: soft data consistency + block combine
#   out = k - mask * (k - ref) * eta - model
# ----------------------------------------------------------------------------
def _dc_kernel(eta_ref, mask_ref, kr_ref, ki_ref, rr_ref, ri_ref,
               mr_ref, mi_ref, or_ref, oi_ref):
    eta = eta_ref[0]
    m = mask_ref[...]                           # (1, 1, T); broadcasts over C
    kr, ki = kr_ref[...], ki_ref[...]
    or_ref[...] = kr - m * (kr - rr_ref[...]) * eta - mr_ref[...]
    oi_ref[...] = ki - m * (ki - ri_ref[...]) * eta - mi_ref[...]


def dc_combine(k_re, k_im, ref_re, ref_im, mod_re, mod_im, mask_hw, eta):
    B, C, HW = k_re.shape
    bpl = 2 * 4 * (8 * _pad8(C) + 8)
    t = _pick_tile(HW, bpl, _HW_TILE_CAP)
    mask_spec = pl.BlockSpec((1, 1, t), lambda b, i: (b, 0, i))
    coil_spec = pl.BlockSpec((1, C, t), lambda b, i: (b, 0, i))
    return pl.pallas_call(
        _dc_kernel,
        grid=(B, pl.cdiv(HW, t)),
        out_shape=(jax.ShapeDtypeStruct((B, C, HW), k_re.dtype),
                   jax.ShapeDtypeStruct((B, C, HW), k_re.dtype)),
        in_specs=[_SMEM_SPEC, mask_spec] + [coil_spec] * 6,
        out_specs=(coil_spec, coil_spec),
        # New k-space planes reuse the old buffers; XLA inserts a defensive
        # copy on block 0 where k == ref is still live.
        input_output_aliases={2: 0, 3: 1},
        compiler_params=_CPARAMS,
    )(eta, mask_hw, k_re, k_im, ref_re, ref_im, mod_re, mod_im)


# ----------------------------------------------------------------------------
# VarNetBlockMTL forward (planar, twiddled state)
# ----------------------------------------------------------------------------
def varnet_block(k_re, k_im, ref_re, ref_im, mask_hw, sens_re, sens_im,
                 eta, reg_params, spatial, use_shifts, R):
    B, C, H, W = spatial
    HW = H * W

    # sens_reduce: (plain / centered) ifft2 then coil combine with conj(sens)
    img_re, img_im = _ifft2_planar(k_re, k_im, spatial, use_shifts)
    comb_re, comb_im = coil_combine(img_re, img_im, sens_re, sens_im)

    # Per-sample / per-plane mean + unbiased std (torch NormUnet.norm) from a
    # single fused sum / sum-of-squares pass in XLA.
    n = float(HW)

    def _stats(x):
        s1 = jnp.sum(x, axis=(1, 2))
        s2 = jnp.sum(x * x, axis=(1, 2))
        mean = s1 / n
        var = jnp.maximum(s2 - n * mean * mean, 0.0) / (n - 1.0)
        return mean, jnp.sqrt(var)

    mean_re, std_re = _stats(comb_re)
    mean_im, std_im = _stats(comb_im)
    stats = jnp.stack([mean_re, mean_im, 1.0 / std_re, 1.0 / std_im,
                       std_re, std_im], axis=-1)            # (B, 6)

    # fused regularizer + sens_expand multiply, then fft2
    out_re, out_im = reg_expand(comb_re, comb_im, stats, reg_params,
                                sens_re, sens_im, R)
    mod_re, mod_im = _fft2_planar(out_re, out_im, spatial, use_shifts)

    # soft data consistency + combine
    return dc_combine(k_re, k_im, ref_re, ref_im, mod_re, mod_im, mask_hw, eta)


# ----------------------------------------------------------------------------
# MTL_VarNet forward
# ----------------------------------------------------------------------------
@functools.partial(jax.jit, static_argnames=("task", "datasets",
                                             "blockstructures", "share_etas"))
def mtl_varnet_forward(masked_kspace, mask, esp_maps, task, params,
                       datasets, blockstructures, share_etas):
    if task not in datasets:
        raise ValueError(f"{task} is not in datasets")
    int_task = datasets.index(task)
    B, C, H, W, _ = masked_kspace.shape
    HW = H * W
    spatial = (B, C, H, W)

    # Checkerboard trick (exact for even H, W): keep the k-space state
    # pre-multiplied by (-1)^(kh+kw) and fold the image-space (-1)^(h+w) and
    # the global (-1)^((H+W)/2) sign into the sens maps, so all per-cascade
    # transforms become plain fft2/ifft2 (no fftshift HBM passes).
    even = (H % 2 == 0) and (W % 2 == 0)
    use_shifts = not even

    ref_re = masked_kspace[..., 0].reshape(B, C, HW)
    ref_im = masked_kspace[..., 1].reshape(B, C, HW)
    sens_re = esp_maps[..., 0].reshape(B, C, HW)
    sens_im = esp_maps[..., 1].reshape(B, C, HW)

    if even:
        iy = jnp.arange(H, dtype=jnp.int32)[:, None]
        ix = jnp.arange(W, dtype=jnp.int32)[None, :]
        chk = (1.0 - 2.0 * ((iy + ix) % 2)).astype(masked_kspace.dtype)
        chk = chk.reshape(1, 1, HW)
        sgn = -1.0 if ((H // 2 + W // 2) % 2) else 1.0
        ref_re, ref_im = ref_re * chk, ref_im * chk          # k-space twiddle
        schk = sgn * chk
        sens_re, sens_im = sens_re * schk, sens_im * schk    # image twiddle

    k_re, k_im = ref_re, ref_im

    # Compact mask row (B, 1, HW).  Assumes the undersampling mask does not
    # vary across coils or the real/imag axis (standard fastMRI masks).
    m = (mask != 0).astype(masked_kspace.dtype)
    m = jnp.broadcast_to(m, (B, C, H, W, 2))
    mask_hw = m[:, 0, :, :, 0].reshape(B, 1, HW)

    # Sublane-packing factor for the regularizer kernel's comb-plane view.
    R = 8 if HW % 8 == 0 else (4 if HW % 4 == 0 else (2 if HW % 2 == 0 else 1))

    for blk, structure in zip(params["blocks"], blockstructures):
        idx_eta = 0 if share_etas else int_task
        eta = blk["etas"][idx_eta].reshape(1)
        share_blocks = structure != "split"
        idx_model = 0 if share_blocks else int_task
        reg_params = blk["models"][idx_model]
        k_re, k_im = varnet_block(k_re, k_im, ref_re, ref_im, mask_hw,
                                  sens_re, sens_im, eta, reg_params,
                                  spatial, use_shifts, R)

    # De-twiddle the predicted k-space once at exit.
    if even:
        kp_re, kp_im = k_re * chk, k_im * chk
    else:
        kp_re, kp_im = k_re, k_im
    kspace_pred = jnp.stack([kp_re, kp_im], axis=-1).reshape(B, C, H, W, 2)

    # Final image combine: the twiddled sens maps make this directly yield the
    # true coil-combined image of ifft2c(kspace_pred).
    img_re, img_im = _ifft2_planar(k_re, k_im, spatial, use_shifts)
    comb_re, comb_im = coil_combine(img_re, img_im, sens_re, sens_im)
    im_comb = jnp.stack([comb_re[:, 0, :], comb_im[:, 0, :]], axis=-1)
    im_comb = im_comb.reshape(B, 1, H, W, 2)
    return kspace_pred, im_comb, params["logsigmas"]


# ----------------------------------------------------------------------------
# Deterministic parameter initialization
# ----------------------------------------------------------------------------
def init_params(key, datasets, blockstructures, share_etas, chans=18):
    blocks = []
    for structure in blockstructures:
        eta_count = 1 if share_etas else len(datasets)
        model_count = 1 if structure != "split" else len(datasets)
        models = []
        for _ in range(model_count):
            key, k1, k2 = jax.random.split(key, 3)
            w1 = jax.random.normal(k1, (2, chans), jnp.float32) * 0.1
            b1 = jnp.zeros((chans,), jnp.float32)
            w2 = jax.random.normal(k2, (chans, 2), jnp.float32) * 0.1
            b2 = jnp.zeros((2,), jnp.float32)
            models.append((w1, b1, w2, b2))
        blocks.append({"etas": jnp.ones((eta_count,), jnp.float32),
                       "models": models})
    logsigmas = jnp.full((len(datasets),), -0.5, jnp.float32)
    return {"blocks": blocks, "logsigmas": logsigmas}


if __name__ == "__main__":
    key = jax.random.PRNGKey(0)
    B, C, H, W = 2, 4, 16, 16           # batch, coils, spatial
    datasets = ("div_coronal_pd_fs", "div_coronal_pd")
    blockstructures = ("trueshare", "trueshare")
    share_etas = True
    chans = 18

    k_ksp, k_map, k_msk, k_par = jax.random.split(key, 4)
    kspace_full = jax.random.normal(k_ksp, (B, C, H, W, 2), jnp.float32)
    esp_maps = jax.random.normal(k_map, (B, C, H, W, 2), jnp.float32) * 0.5
    # fastMRI-style 0/1 undersampling mask broadcastable along W
    mask = (jax.random.uniform(k_msk, (B, 1, 1, W, 1)) > 0.5).astype(jnp.float32)
    masked_kspace = kspace_full * mask

    params = init_params(k_par, datasets, blockstructures, share_etas, chans)

    kspace_pred, im_comb, logsigmas = mtl_varnet_forward(
        masked_kspace, mask, esp_maps,
        task="div_coronal_pd", params=params, datasets=datasets,
        blockstructures=blockstructures, share_etas=share_etas)
    jax.block_until_ready((kspace_pred, im_comb, logsigmas))

    assert kspace_pred.shape == (B, C, H, W, 2)
    assert im_comb.shape == (B, 1, H, W, 2)
    assert logsigmas.shape == (len(datasets),)
    print("KERNEL_OK")
</pallas_src>

<mosaic_0001>
module attributes {stable_mosaic.version = 11 : i64} {
  func.func @_coil_combine_kernel(%arg0: i32, %arg1: i32, %arg2: memref<1x4x256xf32, #tpu.memory_space<vmem>>, %arg3: memref<1x4x256xf32, #tpu.memory_space<vmem>>, %arg4: memref<1x4x256xf32, #tpu.memory_space<vmem>>, %arg5: memref<1x4x256xf32, #tpu.memory_space<vmem>>, %arg6: memref<1x1x256xf32, #tpu.memory_space<vmem>>, %arg7: memref<1x1x256xf32, #tpu.memory_space<vmem>>) attributes {dimension_semantics = [#tpu.dimension_semantics<parallel>, #tpu.dimension_semantics<parallel>], iteration_bounds = array<i64: 2, 1>, scalar_prefetch = 0 : i64, scratch_operands = 0 : i64, tpu.core_type = #tpu.core_type<tc>, window_params = [{transform_indices = @transform_0, window_bounds = array<i64: 1, 4, 256>}, {transform_indices = @transform_1, window_bounds = array<i64: 1, 4, 256>}, {transform_indices = @transform_2, window_bounds = array<i64: 1, 4, 256>}, {transform_indices = @transform_3, window_bounds = array<i64: 1, 4, 256>}, {transform_indices = @transform_4, window_bounds = array<i64: 1, 1, 256>}, {transform_indices = @transform_5, window_bounds = array<i64: 1, 1, 256>}]} {
    %c0 = arith.constant 0 : index
    %c0_0 = arith.constant 0 : index
    %c0_1 = arith.constant 0 : index
    %0 = vector.load %arg2[%c0, %c0_0, %c0_1] : memref<1x4x256xf32, #tpu.memory_space<vmem>>, vector<1x4x256xf32>
    %1 = vector.shape_cast %0 : vector<1x4x256xf32> to vector<4x256xf32>
    %c0_2 = arith.constant 0 : index
    %c0_3 = arith.constant 0 : index
    %c0_4 = arith.constant 0 : index
    %2 = vector.load %arg3[%c0_2, %c0_3, %c0_4] : memref<1x4x256xf32, #tpu.memory_space<vmem>>, vector<1x4x256xf32>
    %3 = vector.shape_cast %2 : vector<1x4x256xf32> to vector<4x256xf32>
    %c0_5 = arith.constant 0 : index
    %c0_6 = arith.constant 0 : index
    %c0_7 = arith.constant 0 : index
    %4 = vector.load %arg4[%c0_5, %c0_6, %c0_7] : memref<1x4x256xf32, #tpu.memory_space<vmem>>, vector<1x4x256xf32>
    %5 = vector.shape_cast %4 : vector<1x4x256xf32> to vector<4x256xf32>
    %c0_8 = arith.constant 0 : index
    %c0_9 = arith.constant 0 : index
    %c0_10 = arith.constant 0 : index
    %6 = vector.load %arg5[%c0_8, %c0_9, %c0_10] : memref<1x4x256xf32, #tpu.memory_space<vmem>>, vector<1x4x256xf32>
    %7 = vector.shape_cast %6 : vector<1x4x256xf32> to vector<4x256xf32>
    %8 = arith.mulf %1, %5 : vector<4x256xf32>
    %9 = arith.mulf %3, %7 : vector<4x256xf32>
    %10 = arith.addf %8, %9 : vector<4x256xf32>
    %cst = arith.constant dense<0.000000e+00> : vector<256xf32>
    %11 = vector.multi_reduction <add>, %10, %cst [0] : vector<4x256xf32> to vector<256xf32>
    %12 = vector.shape_cast %11 : vector<256xf32> to vector<1x256xf32>
    %13 = vector.shape_cast %12 : vector<1x256xf32> to vector<1x1x256xf32>
    %c0_11 = arith.constant 0 : index
    %c0_12 = arith.constant 0 : index
    %c0_13 = arith.constant 0 : index
    %14 = vector.load %arg6[%c0_11, %c0_12, %c0_13] : memref<1x1x256xf32, #tpu.memory_space<vmem>>, vector<1x1x256xf32>
    tpu.vector_store %arg6[%c0_11, %c0_12, %c0_13], %13 {strides = array<i32>} : memref<1x1x256xf32, #tpu.memory_space<vmem>>, vector<1x1x256xf32>,
    %15 = arith.mulf %3, %5 : vector<4x256xf32>
    %16 = arith.mulf %1, %7 : vector<4x256xf32>
    %17 = arith.subf %15, %16 : vector<4x256xf32>
    %cst_14 = arith.constant dense<0.000000e+00> : vector<256xf32>
    %18 = vector.multi_reduction <add>, %17, %cst_14 [0] : vector<4x256xf32> to vector<256xf32>
    %19 = vector.shape_cast %18 : vector<256xf32> to vector<1x256xf32>
    %20 = vector.shape_cast %19 : vector<1x256xf32> to vector<1x1x256xf32>
    %c0_15 = arith.constant 0 : index
    %c0_16 = arith.constant 0 : index
    %c0_17 = arith.constant 0 : index
    %21 = vector.load %arg7[%c0_15, %c0_16, %c0_17] : memref<1x1x256xf32, #tpu.memory_space<vmem>>, vector<1x1x256xf32>
    tpu.vector_store %arg7[%c0_15, %c0_16, %c0_17], %20 {strides = array<i32>} : memref<1x1x256xf32, #tpu.memory_space<vmem>>, vector<1x1x256xf32>,
    return
  }
  func.func @transform_0(%arg0: i32, %arg1: i32) -> (i32, i32, i32) {
    %c0_i32 = arith.constant 0 : i32
    %c0_i32_0 = arith.constant 0 : i32
    return %arg0, %c0_i32, %arg1 : i32, i32, i32
  }
  func.func @transform_1(%arg0: i32, %arg1: i32) -> (i32, i32, i32) {
    %c0_i32 = arith.constant 0 : i32
    %c0_i32_0 = arith.constant 0 : i32
    return %arg0, %c0_i32, %arg1 : i32, i32, i32
  }
  func.func @transform_2(%arg0: i32, %arg1: i32) -> (i32, i32, i32) {
    %c0_i32 = arith.constant 0 : i32
    %c0_i32_0 = arith.constant 0 : i32
    return %arg0, %c0_i32, %arg1 : i32, i32, i32
  }
  func.func @transform_3(%arg0: i32, %arg1: i32) -> (i32, i32, i32) {
    %c0_i32 = arith.constant 0 : i32
    %c0_i32_0 = arith.constant 0 : i32
    return %arg0, %c0_i32, %arg1 : i32, i32, i32
  }
  func.func @transform_4(%arg0: i32, %arg1: i32) -> (i32, i32, i32) {
    %c0_i32 = arith.constant 0 : i32
    %c0_i32_0 = arith.constant 0 : i32
    return %arg0, %c0_i32, %arg1 : i32, i32, i32
  }
  func.func @transform_5(%arg0: i32, %arg1: i32) -> (i32, i32, i32) {
    %c0_i32 = arith.constant 0 : i32
    %c0_i32_0 = arith.constant 0 : i32
    return %arg0, %c0_i32, %arg1 : i32, i32, i32
  }
}

module attributes {stable_mosaic.version = 11 : i64} {
  func.func @_reg_expand_kernel(%arg0: i32, %arg1: i32, %arg2: memref<2x6xf32, #tpu.memory_space<smem>>, %arg3: memref<2x18xf32, #tpu.memory_space<smem>>, %arg4: memref<18xf32, #tpu.memory_space<smem>>, %arg5: memref<18x2xf32, #tpu.memory_space<smem>>, %arg6: memref<2xf32, #tpu.memory_space<smem>>, %arg7: memref<1x8x32xf32, #tpu.memory_space<vmem>>, %arg8: memref<1x8x32xf32, #tpu.memory_space<vmem>>, %arg9: memref<1x4x8x32xf32, #tpu.memory_space<vmem>>, %arg10: memref<1x4x8x32xf32, #tpu.memory_space<vmem>>, %arg11: memref<1x4x8x32xf32, #tpu.memory_space<vmem>>, %arg12: memref<1x4x8x32xf32, #tpu.memory_space<vmem>>) attributes {dimension_semantics = [#tpu.dimension_semantics<parallel>, #tpu.dimension_semantics<parallel>], iteration_bounds = array<i64: 2, 1>, scalar_prefetch = 0 : i64, scratch_operands = 0 : i64, tpu.core_type = #tpu.core_type<tc>, window_params = [{transform_indices = @transform_0, window_bounds = array<i64: 2, 6>}, {transform_indices = @transform_1, window_bounds = array<i64: 2, 18>}, {transform_indices = @transform_2, window_bounds = array<i64: 18>}, {transform_indices = @transform_3, window_bounds = array<i64: 18, 2>}, {transform_indices = @transform_4, window_bounds = array<i64: 2>}, {transform_indices = @transform_5, window_bounds = array<i64: 1, 8, 32>}, {transform_indices = @transform_6, window_bounds = array<i64: 1, 8, 32>}, {transform_indices = @transform_7, window_bounds = array<i64: 1, 4, 8, 32>}, {transform_indices = @transform_8, window_bounds = array<i64: 1, 4, 8, 32>}, {transform_indices = @transform_9, window_bounds = array<i64: 1, 4, 8, 32>}, {transform_indices = @transform_10, window_bounds = array<i64: 1, 4, 8, 32>}]} {
    %c0 = arith.constant 0 : index
    %c0_0 = arith.constant 0 : index
    %c0_1 = arith.constant 0 : index
    %0 = vector.load %arg7[%c0, %c0_0, %c0_1] : memref<1x8x32xf32, #tpu.memory_space<vmem>>, vector<1x8x32xf32>
    %1 = vector.shape_cast %0 : vector<1x8x32xf32> to vector<8x32xf32>
    %c0_2 = arith.constant 0 : index
    %c0_3 = arith.constant 0 : index
    %c0_4 = arith.constant 0 : index
    %2 = vector.load %arg8[%c0_2, %c0_3, %c0_4] : memref<1x8x32xf32, #tpu.memory_space<vmem>>, vector<1x8x32xf32>
    %3 = vector.shape_cast %2 : vector<1x8x32xf32> to vector<8x32xf32>
    %4 = arith.index_cast %arg0 : i32 to index
    %c0_5 = arith.constant 0 : index
    %5 = memref.load %arg2[%4, %c0_5] : memref<2x6xf32, #tpu.memory_space<smem>>
    %6 = arith.index_cast %arg0 : i32 to index
    %c1 = arith.constant 1 : index
    %7 = memref.load %arg2[%6, %c1] : memref<2x6xf32, #tpu.memory_space<smem>>
    %8 = arith.index_cast %arg0 : i32 to index
    %c2 = arith.constant 2 : index
    %9 = memref.load %arg2[%8, %c2] : memref<2x6xf32, #tpu.memory_space<smem>>
    %10 = arith.index_cast %arg0 : i32 to index
    %c3 = arith.constant 3 : index
    %11 = memref.load %arg2[%10, %c3] : memref<2x6xf32, #tpu.memory_space<smem>>
    %12 = arith.index_cast %arg0 : i32 to index
    %c4 = arith.constant 4 : index
    %13 = memref.load %arg2[%12, %c4] : memref<2x6xf32, #tpu.memory_space<smem>>
    %14 = arith.index_cast %arg0 : i32 to index
    %c5 = arith.constant 5 : index
    %15 = memref.load %arg2[%14, %c5] : memref<2x6xf32, #tpu.memory_space<smem>>
    %16 = vector.broadcast %5 : f32 to vector<8x32xf32>
    %17 = arith.subf %1, %16 : vector<8x32xf32>
    %18 = vector.broadcast %9 : f32 to vector<8x32xf32>
    %19 = arith.mulf %17, %18 : vector<8x32xf32>
    %20 = vector.broadcast %7 : f32 to vector<8x32xf32>
    %21 = arith.subf %3, %20 : vector<8x32xf32>
    %22 = vector.broadcast %11 : f32 to vector<8x32xf32>
    %23 = arith.mulf %21, %22 : vector<8x32xf32>
    %cst = arith.constant 0.000000e+00 : f32
    %24 = vector.broadcast %cst : f32 to vector<8x32xf32>
    %cst_6 = arith.constant 0.000000e+00 : f32
    %25 = vector.broadcast %cst_6 : f32 to vector<8x32xf32>
    %c0_7 = arith.constant 0 : index
    %c0_8 = arith.constant 0 : index
    %26 = memref.load %arg3[%c0_7, %c0_8] : memref<2x18xf32, #tpu.memory_space<smem>>
    %27 = vector.broadcast %26 : f32 to vector<8x32xf32>
    %28 = arith.mulf %27, %19 : vector<8x32xf32>
    %c1_9 = arith.constant 1 : index
    %c0_10 = arith.constant 0 : index
    %29 = memref.load %arg3[%c1_9, %c0_10] : memref<2x18xf32, #tpu.memory_space<smem>>
    %30 = vector.broadcast %29 : f32 to vector<8x32xf32>
    %31 = arith.mulf %30, %23 : vector<8x32xf32>
    %32 = arith.addf %28, %31 : vector<8x32xf32>
    %c0_11 = arith.constant 0 : index
    %33 = memref.load %arg4[%c0_11] : memref<18xf32, #tpu.memory_space<smem>>
    %34 = vector.broadcast %33 : f32 to vector<8x32xf32>
    %35 = arith.addf %32, %34 : vector<8x32xf32>
    %cst_12 = arith.constant 0.000000e+00 : f32
    %36 = vector.broadcast %cst_12 : f32 to vector<8x32xf32>
    %37 = arith.maximumf %35, %36 : vector<8x32xf32>
    %c0_13 = arith.constant 0 : index
    %c0_14 = arith.constant 0 : index
    %38 = memref.load %arg5[%c0_13, %c0_14] : memref<18x2xf32, #tpu.memory_space<smem>>
    %39 = vector.broadcast %38 : f32 to vector<8x32xf32>
    %40 = arith.mulf %39, %37 : vector<8x32xf32>
    %41 = arith.addf %24, %40 : vector<8x32xf32>
    %c0_15 = arith.constant 0 : index
    %c1_16 = arith.constant 1 : index
    %42 = memref.load %arg5[%c0_15, %c1_16] : memref<18x2xf32, #tpu.memory_space<smem>>
    %43 = vector.broadcast %42 : f32 to vector<8x32xf32>
    %44 = arith.mulf %43, %37 : vector<8x32xf32>
    %45 = arith.addf %25, %44 : vector<8x32xf32>
    %c0_17 = arith.constant 0 : index
    %c1_18 = arith.constant 1 : index
    %46 = memref.load %arg3[%c0_17, %c1_18] : memref<2x18xf32, #tpu.memory_space<smem>>
    %47 = vector.broadcast %46 : f32 to vector<8x32xf32>
    %48 = arith.mulf %47, %19 : vector<8x32xf32>
    %c1_19 = arith.constant 1 : index
    %c1_20 = arith.constant 1 : index
    %49 = memref.load %arg3[%c1_19, %c1_20] : memref<2x18xf32, #tpu.memory_space<smem>>
    %50 = vector.broadcast %49 : f32 to vector<8x32xf32>
    %51 = arith.mulf %50, %23 : vector<8x32xf32>
    %52 = arith.addf %48, %51 : vector<8x32xf32>
    %c1_21 = arith.constant 1 : index
    %53 = memref.load %arg4[%c1_21] : memref<18xf32, #tpu.memory_space<smem>>
    %54 = vector.broadcast %53 : f32 to vector<8x32xf32>
    %55 = arith.addf %52, %54 : vector<8x32xf32>
    %cst_22 = arith.constant 0.000000e+00 : f32
    %56 = vector.broadcast %cst_22 : f32 to vector<8x32xf32>
    %57 = arith.maximumf %55, %56 : vector<8x32xf32>
    %c1_23 = arith.constant 1 : index
    %c0_24 = arith.constant 0 : index
    %58 = memref.load %arg5[%c1_23, %c0_24] : memref<18x2xf32, #tpu.memory_space<smem>>
    %59 = vector.broadcast %58 : f32 to vector<8x32xf32>
    %60 = arith.mulf %59, %57 : vector<8x32xf32>
    %61 = arith.addf %41, %60 : vector<8x32xf32>
    %c1_25 = arith.constant 1 : index
    %c1_26 = arith.constant 1 : index
    %62 = memref.load %arg5[%c1_25, %c1_26] : memref<18x2xf32, #tpu.memory_space<smem>>
    %63 = vector.broadcast %62 : f32 to vector<8x32xf32>
    %64 = arith.mulf %63, %57 : vector<8x32xf32>
    %65 = arith.addf %45, %64 : vector<8x32xf32>
    %c0_27 = arith.constant 0 : index
    %c2_28 = arith.constant 2 : index
    %66 = memref.load %arg3[%c0_27, %c2_28] : memref<2x18xf32, #tpu.memory_space<smem>>
    %67 = vector.broadcast %66 : f32 to vector<8x32xf32>
    %68 = arith.mulf %67, %19 : vector<8x32xf32>
    %c1_29 = arith.constant 1 : index
    %c2_30 = arith.constant 2 : index
    %69 = memref.load %arg3[%c1_29, %c2_30] : memref<2x18xf32, #tpu.memory_space<smem>>
    %70 = vector.broadcast %69 : f32 to vector<8x32xf32>
    %71 = arith.mulf %70, %23 : vector<8x32xf32>
    %72 = arith.addf %68, %71 : vector<8x32xf32>
    %c2_31 = arith.constant 2 : index
    %73 = memref.load %arg4[%c2_31] : memref<18xf32, #tpu.memory_space<smem>>
    %74 = vector.broadcast %73 : f32 to vector<8x32xf32>
    %75 = arith.addf %72, %74 : vector<8x32xf32>
    %cst_32 = arith.constant 0.000000e+00 : f32
    %76 = vector.broadcast %cst_32 : f32 to vector<8x32xf32>
    %77 = arith.maximumf %75, %76 : vector<8x32xf32>
    %c2_33 = arith.constant 2 : index
    %c0_34 = arith.constant 0 : index
    %78 = memref.load %arg5[%c2_33, %c0_34] : memref<18x2xf32, #tpu.memory_space<smem>>
    %79 = vector.broadcast %78 : f32 to vector<8x32xf32>
    %80 = arith.mulf %79, %77 : vector<8x32xf32>
    %81 = arith.addf %61, %80 : vector<8x32xf32>
    %c2_35 = arith.constant 2 : index
    %c1_36 = arith.constant 1 : index
    %82 = memref.load %arg5[%c2_35, %c1_36] : memref<18x2xf32, #tpu.memory_space<smem>>
    %83 = vector.broadcast %82 : f32 to vector<8x32xf32>
    %84 = arith.mulf %83, %77 : vector<8x32xf32>
    %85 = arith.addf %65, %84 : vector<8x32xf32>
    %c0_37 = arith.constant 0 : index
    %c3_38 = arith.constant 3 : index
    %86 = memref.load %arg3[%c0_37, %c3_38] : memref<2x18xf32, #tpu.memory_space<smem>>
    %87 = vector.broadcast %86 : f32 to vector<8x32xf32>
    %88 = arith.mulf %87, %19 : vector<8x32xf32>
    %c1_39 = arith.constant 1 : index
    %c3_40 = arith.constant 3 : index
    %89 = memref.load %arg3[%c1_39, %c3_40] : memref<2x18xf32, #tpu.memory_space<smem>>
    %90 = vector.broadcast %89 : f32 to vector<8x32xf32>
    %91 = arith.mulf %90, %23 : vector<8x32xf32>
    %92 = arith.addf %88, %91 : vector<8x32xf32>
    %c3_41 = arith.constant 3 : index
    %93 = memref.load %arg4[%c3_41] : memref<18xf32, #tpu.memory_space<smem>>
    %94 = vector.broadcast %93 : f32 to vector<8x32xf32>
    %95 = arith.addf %92, %94 : vector<8x32xf32>
    %cst_42 = arith.constant 0.000000e+00 : f32
    %96 = vector.broadcast %cst_42 : f32 to vector<8x32xf32>
    %97 = arith.maximumf %95, %96 : vector<8x32xf32>
    %c3_43 = arith.constant 3 : index
    %c0_44 = arith.constant 0 : index
    %98 = memref.load %arg5[%c3_43, %c0_44] : memref<18x2xf32, #tpu.memory_space<smem>>
    %99 = vector.broadcast %98 : f32 to vector<8x32xf32>
    %100 = arith.mulf %99, %97 : vector<8x32xf32>
    %101 = arith.addf %81, %100 : vector<8x32xf32>
    %c3_45 = arith.constant 3 : index
    %c1_46 = arith.constant 1 : index
    %102 = memref.load %arg5[%c3_45, %c1_46] : memref<18x2xf32, #tpu.memory_space<smem>>
    %103 = vector.broadcast %102 : f32 to vector<8x32xf32>
    %104 = arith.mulf %103, %97 : vector<8x32xf32>
    %105 = arith.addf %85, %104 : vector<8x32xf32>
    %c0_47 = arith.constant 0 : index
    %c4_48 = arith.constant 4 : index
    %106 = memref.load %arg3[%c0_47, %c4_48] : memref<2x18xf32, #tpu.memory_space<smem>>
    %107 = vector.broadcast %106 : f32 to vector<8x32xf32>
    %108 = arith.mulf %107, %19 : vector<8x32xf32>
    %c1_49 = arith.constant 1 : index
    %c4_50 = arith.constant 4 : index
    %109 = memref.load %arg3[%c1_49, %c4_50] : memref<2x18xf32, #tpu.memory_space<smem>>
    %110 = vector.broadcast %109 : f32 to vector<8x32xf32>
    %111 = arith.mulf %110, %23 : vector<8x32xf32>
    %112 = arith.addf %108, %111 : vector<8x32xf32>
    %c4_51 = arith.constant 4 : index
    %113 = memref.load %arg4[%c4_51] : memref<18xf32, #tpu.memory_space<smem>>
    %114 = vector.broadcast %113 : f32 to vector<8x32xf32>
    %115 = arith.addf %112, %114 : vector<8x32xf32>
    %cst_52 = arith.constant 0.000000e+00 : f32
    %116 = vector.broadcast %cst_52 : f32 to vector<8x32xf32>
    %117 = arith.maximumf %115, %116 : vector<8x32xf32>
    %c4_53 = arith.constant 4 : index
    %c0_54 = arith.constant 0 : index
    %118 = memref.load %arg5[%c4_53, %c0_54] : memref<18x2xf32, #tpu.memory_space<smem>>
    %119 = vector.broadcast %118 : f32 to vector<8x32xf32>
    %120 = arith.mulf %119, %117 : vector<8x32xf32>
    %121 = arith.addf %101, %120 : vector<8x32xf32>
    %c4_55 = arith.constant 4 : index
    %c1_56 = arith.constant 1 : index
    %122 = memref.load %arg5[%c4_55, %c1_56] : memref<18x2xf32, #tpu.memory_space<smem>>
    %123 = vector.broadcast %122 : f32 to vector<8x32xf32>
    %124 = arith.mulf %123, %117 : vector<8x32xf32>
    %125 = arith.addf %105, %124 : vector<8x32xf32>
    %c0_57 = arith.constant 0 : index
    %c5_58 = arith.constant 5 : index
    %126 = memref.load %arg3[%c0_57, %c5_58] : memref<2x18xf32, #tpu.memory_space<smem>>
    %127 = vector.broadcast %126 : f32 to vector<8x32xf32>
    %128 = arith.mulf %127, %19 : vector<8x32xf32>
    %c1_59 = arith.constant 1 : index
    %c5_60 = arith.constant 5 : index
    %129 = memref.load %arg3[%c1_59, %c5_60] : memref<2x18xf32, #tpu.memory_space<smem>>
    %130 = vector.broadcast %129 : f32 to vector<8x32xf32>
    %131 = arith.mulf %130, %23 : vector<8x32xf32>
    %132 = arith.addf %128, %131 : vector<8x32xf32>
    %c5_61 = arith.constant 5 : index
    %133 = memref.load %arg4[%c5_61] : memref<18xf32, #tpu.memory_space<smem>>
    %134 = vector.broadcast %133 : f32 to vector<8x32xf32>
    %135 = arith.addf %132, %134 : vector<8x32xf32>
    %cst_62 = arith.constant 0.000000e+00 : f32
    %136 = vector.broadcast %cst_62 : f32 to vector<8x32xf32>
    %137 = arith.maximumf %135, %136 : vector<8x32xf32>
    %c5_63 = arith.constant 5 : index
    %c0_64 = arith.constant 0 : index
    %138 = memref.load %arg5[%c5_63, %c0_64] : memref<18x2xf32, #tpu.memory_space<smem>>
    %139 = vector.broadcast %138 : f32 to vector<8x32xf32>
    %140 = arith.mulf %139, %137 : vector<8x32xf32>
    %141 = arith.addf %121, %140 : vector<8x32xf32>
    %c5_65 = arith.constant 5 : index
    %c1_66 = arith.constant 1 : index
    %142 = memref.load %arg5[%c5_65, %c1_66] : memref<18x2xf32, #tpu.memory_space<smem>>
    %143 = vector.broadcast %142 : f32 to vector<8x32xf32>
    %144 = arith.mulf %143, %137 : vector<8x32xf32>
    %145 = arith.addf %125, %144 : vector<8x32xf32>
    %c0_67 = arith.constant 0 : index
    %c6 = arith.constant 6 : index
    %146 = memref.load %arg3[%c0_67, %c6] : memref<2x18xf32, #tpu.memory_space<smem>>
    %147 = vector.broadcast %146 : f32 to vector<8x32xf32>
    %148 = arith.mulf %147, %19 : vector<8x32xf32>
    %c1_68 = arith.constant 1 : index
    %c6_69 = arith.constant 6 : index
    %149 = memref.load %arg3[%c1_68, %c6_69] : memref<2x18xf32, #tpu.memory_space<smem>>
    %150 = vector.broadcast %149 : f32 to vector<8x32xf32>
    %151 = arith.mulf %150, %23 : vector<8x32xf32>
    %152 = arith.addf %148, %151 : vector<8x32xf32>
    %c6_70 = arith.constant 6 : index
    %153 = memref.load %arg4[%c6_70] : memref<18xf32, #tpu.memory_space<smem>>
    %154 = vector.broadcast %153 : f32 to vector<8x32xf32>
    %155 = arith.addf %152, %154 : vector<8x32xf32>
    %cst_71 = arith.constant 0.000000e+00 : f32
    %156 = vector.broadcast %cst_71 : f32 to vector<8x32xf32>
    %157 = arith.maximumf %155, %156 : vector<8x32xf32>
    %c6_72 = arith.constant 6 : index
    %c0_73 = arith.constant 0 : index
    %158 = memref.load %arg5[%c6_72, %c0_73] : memref<18x2xf32, #tpu.memory_space<smem>>
    %159 = vector.broadcast %158 : f32 to vector<8x32xf32>
    %160 = arith.mulf %159, %157 : vector<8x32xf32>
    %161 = arith.addf %141, %160 : vector<8x32xf32>
    %c6_74 = arith.constant 6 : index
    %c1_75 = arith.constant 1 : index
    %162 = memref.load %arg5[%c6_74, %c1_75] : memref<18x2xf32, #tpu.memory_space<smem>>
    %163 = vector.broadcast %162 : f32 to vector<8x32xf32>
    %164 = arith.mulf %163, %157 : vector<8x32xf32>
    %165 = arith.addf %145, %164 : vector<8x32xf32>
    %c0_76 = arith.constant 0 : index
    %c7 = arith.constant 7 : index
    %166 = memref.load %arg3[%c0_76, %c7] : memref<2x18xf32, #tpu.memory_space<smem>>
    %167 = vector.broadcast %166 : f32 to vector<8x32xf32>
    %168 = arith.mulf %167, %19 : vector<8x32xf32>
    %c1_77 = arith.constant 1 : index
    %c7_78 = arith.constant 7 : index
    %169 = memref.load %arg3[%c1_77, %c7_78] : memref<2x18xf32, #tpu.memory_space<smem>>
    %170 = vector.broadcast %169 : f32 to vector<8x32xf32>
    %171 = arith.mulf %170, %23 : vector<8x32xf32>
    %172 = arith.addf %168, %171 : vector<8x32xf32>
    %c7_79 = arith.constant 7 : index
    %173 = memref.load %arg4[%c7_79] : memref<18xf32, #tpu.memory_space<smem>>
    %174 = vector.broadcast %173 : f32 to vector<8x32xf32>
    %175 = arith.addf %172, %174 : vector<8x32xf32>
    %cst_80 = arith.constant 0.000000e+00 : f32
    %176 = vector.broadcast %cst_80 : f32 to vector<8x32xf32>
    %177 = arith.maximumf %175, %176 : vector<8x32xf32>
    %c7_81 = arith.constant 7 : index
    %c0_82 = arith.constant 0 : index
    %178 = memref.load %arg5[%c7_81, %c0_82] : memref<18x2xf32, #tpu.memory_space<smem>>
    %179 = vector.broadcast %178 : f32 to vector<8x32xf32>
    %180 = arith.mulf %179, %177 : vector<8x32xf32>
    %181 = arith.addf %161, %180 : vector<8x32xf32>
    %c7_83 = arith.constant 7 : index
    %c1_84 = arith.constant 1 : index
    %182 = memref.load %arg5[%c7_83, %c1_84] : memref<18x2xf32, #tpu.memory_space<smem>>
    %183 = vector.broadcast %182 : f32 to vector<8x32xf32>
    %184 = arith.mulf %183, %177 : vector<8x32xf32>
    %185 = arith.addf %165, %184 : vector<8x32xf32>
    %c0_85 = arith.constant 0 : index
    %c8 = arith.constant 8 : index
    %186 = memref.load %arg3[%c0_85, %c8] : memref<2x18xf32, #tpu.memory_space<smem>>
    %187 = vector.broadcast %186 : f32 to vector<8x32xf32>
    %188 = arith.mulf %187, %19 : vector<8x32xf32>
    %c1_86 = arith.constant 1 : index
    %c8_87 = arith.constant 8 : index
    %189 = memref.load %arg3[%c1_86, %c8_87] : memref<2x18xf32, #tpu.memory_space<smem>>
    %190 = vector.broadcast %189 : f32 to vector<8x32xf32>
    %191 = arith.mulf %190, %23 : vector<8x32xf32>
    %192 = arith.addf %188, %191 : vector<8x32xf32>
    %c8_88 = arith.constant 8 : index
    %193 = memref.load %arg4[%c8_88] : memref<18xf32, #tpu.memory_space<smem>>
    %194 = vector.broadcast %193 : f32 to vector<8x32xf32>
    %195 = arith.addf %192, %194 : vector<8x32xf32>
    %cst_89 = arith.constant 0.000000e+00 : f32
    %196 = vector.broadcast %cst_89 : f32 to vector<8x32xf32>
    %197 = arith.maximumf %195, %196 : vector<8x32xf32>
    %c8_90 = arith.constant 8 : index
    %c0_91 = arith.constant 0 : index
    %198 = memref.load %arg5[%c8_90, %c0_91] : memref<18x2xf32, #tpu.memory_space<smem>>
    %199 = vector.broadcast %198 : f32 to vector<8x32xf32>
    %200 = arith.mulf %199, %197 : vector<8x32xf32>
    %201 = arith.addf %181, %200 : vector<8x32xf32>
    %c8_92 = arith.constant 8 : index
    %c1_93 = arith.constant 1 : index
    %202 = memref.load %arg5[%c8_92, %c1_93] : memref<18x2xf32, #tpu.memory_space<smem>>
    %203 = vector.broadcast %202 : f32 to vector<8x32xf32>
    %204 = arith.mulf %203, %197 : vector<8x32xf32>
    %205 = arith.addf %185, %204 : vector<8x32xf32>
    %c0_94 = arith.constant 0 : index
    %c9 = arith.constant 9 : index
    %206 = memref.load %arg3[%c0_94, %c9] : memref<2x18xf32, #tpu.memory_space<smem>>
    %207 = vector.broadcast %206 : f32 to vector<8x32xf32>
    %208 = arith.mulf %207, %19 : vector<8x32xf32>
    %c1_95 = arith.constant 1 : index
    %c9_96 = arith.constant 9 : index
    %209 = memref.load %arg3[%c1_95, %c9_96] : memref<2x18xf32, #tpu.memory_space<smem>>
    %210 = vector.broadcast %209 : f32 to vector<8x32xf32>
    %211 = arith.mulf %210, %23 : vector<8x32xf32>
    %212 = arith.addf %208, %211 : vector<8x32xf32>
    %c9_97 = arith.constant 9 : index
    %213 = memref.load %arg4[%c9_97] : memref<18xf32, #tpu.memory_space<smem>>
    %214 = vector.broadcast %213 : f32 to vector<8x32xf32>
    %215 = arith.addf %212, %214 : vector<8x32xf32>
    %cst_98 = arith.constant 0.000000e+00 : f32
    %216 = vector.broadcast %cst_98 : f32 to vector<8x32xf32>
    %217 = arith.maximumf %215, %216 : vector<8x32xf32>
    %c9_99 = arith.constant 9 : index
    %c0_100 = arith.constant 0 : index
    %218 = memref.load %arg5[%c9_99, %c0_100] : memref<18x2xf32, #tpu.memory_space<smem>>
    %219 = vector.broadcast %218 : f32 to vector<8x32xf32>
    %220 = arith.mulf %219, %217 : vector<8x32xf32>
    %221 = arith.addf %201, %220 : vector<8x32xf32>
    %c9_101 = arith.constant 9 : index
    %c1_102 = arith.constant 1 : index
    %222 = memref.load %arg5[%c9_101, %c1_102] : memref<18x2xf32, #tpu.memory_space<smem>>
    %223 = vector.broadcast %222 : f32 to vector<8x32xf32>
    %224 = arith.mulf %223, %217 : vector<8x32xf32>
    %225 = arith.addf %205, %224 : vector<8x32xf32>
    %c0_103 = arith.constant 0 : index
    %c10 = arith.constant 10 : index
    %226 = memref.load %arg3[%c0_103, %c10] : memref<2x18xf32, #tpu.memory_space<smem>>
    %227 = vector.broadcast %226 : f32 to vector<8x32xf32>
    %228 = arith.mulf %227, %19 : vector<8x32xf32>
    %c1_104 = arith.constant 1 : index
    %c10_105 = arith.constant 10 : index
    %229 = memref.load %arg3[%c1_104, %c10_105] : memref<2x18xf32, #tpu.memory_space<smem>>
    %230 = vector.broadcast %229 : f32 to vector<8x32xf32>
    %231 = arith.mulf %230, %23 : vector<8x32xf32>
    %232 = arith.addf %228, %231 : vector<8x32xf32>
    %c10_106 = arith.constant 10 : index
    %233 = memref.load %arg4[%c10_106] : memref<18xf32, #tpu.memory_space<smem>>
    %234 = vector.broadcast %233 : f32 to vector<8x32xf32>
    %235 = arith.addf %232, %234 : vector<8x32xf32>
    %cst_107 = arith.constant 0.000000e+00 : f32
    %236 = vector.broadcast %cst_107 : f32 to vector<8x32xf32>
    %237 = arith.maximumf %235, %236 : vector<8x32xf32>
    %c10_108 = arith.constant 10 : index
    %c0_109 = arith.constant 0 : index
    %238 = memref.load %arg5[%c10_108, %c0_109] : memref<18x2xf32, #tpu.memory_space<smem>>
    %239 = vector.broadcast %238 : f32 to vector<8x32xf32>
    %240 = arith.mulf %239, %237 : vector<8x32xf32>
    %241 = arith.addf %221, %240 : vector<8x32xf32>
    %c10_110 = arith.constant 10 : index
    %c1_111 = arith.constant 1 : index
    %242 = memref.load %arg5[%c10_110, %c1_111] : memref<18x2xf32, #tpu.memory_space<smem>>
    %243 = vector.broadcast %242 : f32 to vector<8x32xf32>
    %244 = arith.mulf %243, %237 : vector<8x32xf32>
    %245 = arith.addf %225, %244 : vector<8x32xf32>
    %c0_112 = arith.constant 0 : index
    %c11 = arith.constant 11 : index
    %246 = memref.load %arg3[%c0_112, %c11] : memref<2x18xf32, #tpu.memory_space<smem>>
    %247 = vector.broadcast %246 : f32 to vector<8x32xf32>
    %248 = arith.mulf %247, %19 : vector<8x32xf32>
    %c1_113 = arith.constant 1 : index
    %c11_114 = arith.constant 11 : index
    %249 = memref.load %arg3[%c1_113, %c11_114] : memref<2x18xf32, #tpu.memory_space<smem>>
    %250 = vector.broadcast %249 : f32 to vector<8x32xf32>
    %251 = arith.mulf %250, %23 : vector<8x32xf32>
    %252 = arith.addf %248, %251 : vector<8x32xf32>
    %c11_115 = arith.constant 11 : index
    %253 = memref.load %arg4[%c11_115] : memref<18xf32, #tpu.memory_space<smem>>
    %254 = vector.broadcast %253 : f32 to vector<8x32xf32>
    %255 = arith.addf %252, %254 : vector<8x32xf32>
    %cst_116 = arith.constant 0.000000e+00 : f32
    %256 = vector.broadcast %cst_116 : f32 to vector<8x32xf32>
    %257 = arith.maximumf %255, %256 : vector<8x32xf32>
    %c11_117 = arith.constant 11 : index
    %c0_118 = arith.constant 0 : index
    %258 = memref.load %arg5[%c11_117, %c0_118] : memref<18x2xf32, #tpu.memory_space<smem>>
    %259 = vector.broadcast %258 : f32 to vector<8x32xf32>
    %260 = arith.mulf %259, %257 : vector<8x32xf32>
    %261 = arith.addf %241, %260 : vector<8x32xf32>
    %c11_119 = arith.constant 11 : index
    %c1_120 = arith.constant 1 : index
    %262 = memref.load %arg5[%c11_119, %c1_120] : memref<18x2xf32, #tpu.memory_space<smem>>
    %263 = vector.broadcast %262 : f32 to vector<8x32xf32>
    %264 = arith.mulf %263, %257 : vector<8x32xf32>
    %265 = arith.addf %245, %264 : vector<8x32xf32>
    %c0_121 = arith.constant 0 : index
    %c12 = arith.constant 12 : index
    %266 = memref.load %arg3[%c0_121, %c12] : memref<2x18xf32, #tpu.memory_space<smem>>
    %267 = vector.broadcast %266 : f32 to vector<8x32xf32>
    %268 = arith.mulf %267, %19 : vector<8x32xf32>
    %c1_122 = arith.constant 1 : index
    %c12_123 = arith.constant 12 : index
    %269 = memref.load %arg3[%c1_122, %c12_123] : memref<2x18xf32, #tpu.memory_space<smem>>
    %270 = vector.broadcast %269 : f32 to vector<8x32xf32>
    %271 = arith.mulf %270, %23 : vector<8x32xf32>
    %272 = arith.addf %268, %271 : vector<8x32xf32>
    %c12_124 = arith.constant 12 : index
    %273 = memref.load %arg4[%c12_124] : memref<18xf32, #tpu.memory_space<smem>>
    %274 = vector.broadcast %273 : f32 to vector<8x32xf32>
    %275 = arith.addf %272, %274 : vector<8x32xf32>
    %cst_125 = arith.constant 0.000000e+00 : f32
    %276 = vector.broadcast %cst_125 : f32 to vector<8x32xf32>
    %277 = arith.maximumf %275, %276 : vector<8x32xf32>
    %c12_126 = arith.constant 12 : index
    %c0_127 = arith.constant 0 : index
    %278 = memref.load %arg5[%c12_126, %c0_127] : memref<18x2xf32, #tpu.memory_space<smem>>
    %279 = vector.broadcast %278 : f32 to vector<8x32xf32>
    %280 = arith.mulf %279, %277 : vector<8x32xf32>
    %281 = arith.addf %261, %280 : vector<8x32xf32>
    %c12_128 = arith.constant 12 : index
    %c1_129 = arith.constant 1 : index
    %282 = memref.load %arg5[%c12_128, %c1_129] : memref<18x2xf32, #tpu.memory_space<smem>>
    %283 = vector.broadcast %282 : f32 to vector<8x32xf32>
    %284 = arith.mulf %283, %277 : vector<8x32xf32>
    %285 = arith.addf %265, %284 : vector<8x32xf32>
    %c0_130 = arith.constant 0 : index
    %c13 = arith.constant 13 : index
    %286 = memref.load %arg3[%c0_130, %c13] : memref<2x18xf32, #tpu.memory_space<smem>>
    %287 = vector.broadcast %286 : f32 to vector<8x32xf32>
    %288 = arith.mulf %287, %19 : vector<8x32xf32>
    %c1_131 = arith.constant 1 : index
    %c13_132 = arith.constant 13 : index
    %289 = memref.load %arg3[%c1_131, %c13_132] : memref<2x18xf32, #tpu.memory_space<smem>>
    %290 = vector.broadcast %289 : f32 to vector<8x32xf32>
    %291 = arith.mulf %290, %23 : vector<8x32xf32>
    %292 = arith.addf %288, %291 : vector<8x32xf32>
    %c13_133 = arith.constant 13 : index
    %293 = memref.load %arg4[%c13_133] : memref<18xf32, #tpu.memory_space<smem>>
    %294 = vector.broadcast %293 : f32 to vector<8x32xf32>
    %295 = arith.addf %292, %294 : vector<8x32xf32>
    %cst_134 = arith.constant 0.000000e+00 : f32
    %296 = vector.broadcast %cst_134 : f32 to vector<8x32xf32>
    %297 = arith.maximumf %295, %296 : vector<8x32xf32>
    %c13_135 = arith.constant 13 : index
    %c0_136 = arith.constant 0 : index
    %298 = memref.load %arg5[%c13_135, %c0_136] : memref<18x2xf32, #tpu.memory_space<smem>>
    %299 = vector.broadcast %298 : f32 to vector<8x32xf32>
    %300 = arith.mulf %299, %297 : vector<8x32xf32>
    %301 = arith.addf %281, %300 : vector<8x32xf32>
    %c13_137 = arith.constant 13 : index
    %c1_138 = arith.constant 1 : index
    %302 = memref.load %arg5[%c13_137, %c1_138] : memref<18x2xf32, #tpu.memory_space<smem>>
    %303 = vector.broadcast %302 : f32 to vector<8x32xf32>
    %304 = arith.mulf %303, %297 : vector<8x32xf32>
    %305 = arith.addf %285, %304 : vector<8x32xf32>
    %c0_139 = arith.constant 0 : index
    %c14 = arith.constant 14 : index
    %306 = memref.load %arg3[%c0_139, %c14] : memref<2x18xf32, #tpu.memory_space<smem>>
    %307 = vector.broadcast %306 : f32 to vector<8x32xf32>
    %308 = arith.mulf %307, %19 : vector<8x32xf32>
    %c1_140 = arith.constant 1 : index
    %c14_141 = arith.constant 14 : index
    %309 = memref.load %arg3[%c1_140, %c14_141] : memref<2x18xf32, #tpu.memory_space<smem>>
    %310 = vector.broadcast %309 : f32 to vector<8x32xf32>
    %311 = arith.mulf %310, %23 : vector<8x32xf32>
    %312 = arith.addf %308, %311 : vector<8x32xf32>
    %c14_142 = arith.constant 14 : index
    %313 = memref.load %arg4[%c14_142] : memref<18xf32, #tpu.memory_space<smem>>
    %314 = vector.broadcast %313 : f32 to vector<8x32xf32>
    %315 = arith.addf %312, %314 : vector<8x32xf32>
    %cst_143 = arith.constant 0.000000e+00 : f32
    %316 = vector.broadcast %cst_143 : f32 to vector<8x32xf32>
    %317 = arith.maximumf %315, %316 : vector<8x32xf32>
    %c14_144 = arith.constant 14 : index
    %c0_145 = arith.constant 0 : index
    %318 = memref.load %arg5[%c14_144, %c0_145] : memref<18x2xf32, #tpu.memory_space<smem>>
    %319 = vector.broadcast %318 : f32 to vector<8x32xf32>
    %320 = arith.mulf %319, %317 : vector<8x32xf32>
    %321 = arith.addf %301, %320 : vector<8x32xf32>
    %c14_146 = arith.constant 14 : index
    %c1_147 = arith.constant 1 : index
    %322 = memref.load %arg5[%c14_146, %c1_147] : memref<18x2xf32, #tpu.memory_space<smem>>
    %323 = vector.broadcast %322 : f32 to vector<8x32xf32>
    %324 = arith.mulf %323, %317 : vector<8x32xf32>
    %325 = arith.addf %305, %324 : vector<8x32xf32>
    %c0_148 = arith.constant 0 : index
    %c15 = arith.constant 15 : index
    %326 = memref.load %arg3[%c0_148, %c15] : memref<2x18xf32, #tpu.memory_space<smem>>
    %327 = vector.broadcast %326 : f32 to vector<8x32xf32>
    %328 = arith.mulf %327, %19 : vector<8x32xf32>
    %c1_149 = arith.constant 1 : index
    %c15_150 = arith.constant 15 : index
    %329 = memref.load %arg3[%c1_149, %c15_150] : memref<2x18xf32, #tpu.memory_space<smem>>
    %330 = vector.broadcast %329 : f32 to vector<8x32xf32>
    %331 = arith.mulf %330, %23 : vector<8x32xf32>
    %332 = arith.addf %328, %331 : vector<8x32xf32>
    %c15_151 = arith.constant 15 : index
    %333 = memref.load %arg4[%c15_151] : memref<18xf32, #tpu.memory_space<smem>>
    %334 = vector.broadcast %333 : f32 to vector<8x32xf32>
    %335 = arith.addf %332, %334 : vector<8x32xf32>
    %cst_152 = arith.constant 0.000000e+00 : f32
    %336 = vector.broadcast %cst_152 : f32 to vector<8x32xf32>
    %337 = arith.maximumf %335, %336 : vector<8x32xf32>
    %c15_153 = arith.constant 15 : index
    %c0_154 = arith.constant 0 : index
    %338 = memref.load %arg5[%c15_153, %c0_154] : memref<18x2xf32, #tpu.memory_space<smem>>
    %339 = vector.broadcast %338 : f32 to vector<8x32xf32>
    %340 = arith.mulf %339, %337 : vector<8x32xf32>
    %341 = arith.addf %321, %340 : vector<8x32xf32>
    %c15_155 = arith.constant 15 : index
    %c1_156 = arith.constant 1 : index
    %342 = memref.load %arg5[%c15_155, %c1_156] : memref<18x2xf32, #tpu.memory_space<smem>>
    %343 = vector.broadcast %342 : f32 to vector<8x32xf32>
    %344 = arith.mulf %343, %337 : vector<8x32xf32>
    %345 = arith.addf %325, %344 : vector<8x32xf32>
    %c0_157 = arith.constant 0 : index
    %c16 = arith.constant 16 : index
    %346 = memref.load %arg3[%c0_157, %c16] : memref<2x18xf32, #tpu.memory_space<smem>>
    %347 = vector.broadcast %346 : f32 to vector<8x32xf32>
    %348 = arith.mulf %347, %19 : vector<8x32xf32>
    %c1_158 = arith.constant 1 : index
    %c16_159 = arith.constant 16 : index
    %349 = memref.load %arg3[%c1_158, %c16_159] : memref<2x18xf32, #tpu.memory_space<smem>>
    %350 = vector.broadcast %349 : f32 to vector<8x32xf32>
    %351 = arith.mulf %350, %23 : vector<8x32xf32>
    %352 = arith.addf %348, %351 : vector<8x32xf32>
    %c16_160 = arith.constant 16 : index
    %353 = memref.load %arg4[%c16_160] : memref<18xf32, #tpu.memory_space<smem>>
    %354 = vector.broadcast %353 : f32 to vector<8x32xf32>
    %355 = arith.addf %352, %354 : vector<8x32xf32>
    %cst_161 = arith.constant 0.000000e+00 : f32
    %356 = vector.broadcast %cst_161 : f32 to vector<8x32xf32>
    %357 = arith.maximumf %355, %356 : vector<8x32xf32>
    %c16_162 = arith.constant 16 : index
    %c0_163 = arith.constant 0 : index
    %358 = memref.load %arg5[%c16_162, %c0_163] : memref<18x2xf32, #tpu.memory_space<smem>>
    %359 = vector.broadcast %358 : f32 to vector<8x32xf32>
    %360 = arith.mulf %359, %357 : vector<8x32xf32>
    %361 = arith.addf %341, %360 : vector<8x32xf32>
    %c16_164 = arith.constant 16 : index
    %c1_165 = arith.constant 1 : index
    %362 = memref.load %arg5[%c16_164, %c1_165] : memref<18x2xf32, #tpu.memory_space<smem>>
    %363 = vector.broadcast %362 : f32 to vector<8x32xf32>
    %364 = arith.mulf %363, %357 : vector<8x32xf32>
    %365 = arith.addf %345, %364 : vector<8x32xf32>
    %c0_166 = arith.constant 0 : index
    %c17 = arith.constant 17 : index
    %366 = memref.load %arg3[%c0_166, %c17] : memref<2x18xf32, #tpu.memory_space<smem>>
    %367 = vector.broadcast %366 : f32 to vector<8x32xf32>
    %368 = arith.mulf %367, %19 : vector<8x32xf32>
    %c1_167 = arith.constant 1 : index
    %c17_168 = arith.constant 17 : index
    %369 = memref.load %arg3[%c1_167, %c17_168] : memref<2x18xf32, #tpu.memory_space<smem>>
    %370 = vector.broadcast %369 : f32 to vector<8x32xf32>
    %371 = arith.mulf %370, %23 : vector<8x32xf32>
    %372 = arith.addf %368, %371 : vector<8x32xf32>
    %c17_169 = arith.constant 17 : index
    %373 = memref.load %arg4[%c17_169] : memref<18xf32, #tpu.memory_space<smem>>
    %374 = vector.broadcast %373 : f32 to vector<8x32xf32>
    %375 = arith.addf %372, %374 : vector<8x32xf32>
    %cst_170 = arith.constant 0.000000e+00 : f32
    %376 = vector.broadcast %cst_170 : f32 to vector<8x32xf32>
    %377 = arith.maximumf %375, %376 : vector<8x32xf32>
    %c17_171 = arith.constant 17 : index
    %c0_172 = arith.constant 0 : index
    %378 = memref.load %arg5[%c17_171, %c0_172] : memref<18x2xf32, #tpu.memory_space<smem>>
    %379 = vector.broadcast %378 : f32 to vector<8x32xf32>
    %380 = arith.mulf %379, %377 : vector<8x32xf32>
    %381 = arith.addf %361, %380 : vector<8x32xf32>
    %c17_173 = arith.constant 17 : index
    %c1_174 = arith.constant 1 : index
    %382 = memref.load %arg5[%c17_173, %c1_174] : memref<18x2xf32, #tpu.memory_space<smem>>
    %383 = vector.broadcast %382 : f32 to vector<8x32xf32>
    %384 = arith.mulf %383, %377 : vector<8x32xf32>
    %385 = arith.addf %365, %384 : vector<8x32xf32>
    %c0_175 = arith.constant 0 : index
    %386 = memref.load %arg6[%c0_175] : memref<2xf32, #tpu.memory_space<smem>>
    %387 = vector.broadcast %386 : f32 to vector<8x32xf32>
    %388 = arith.addf %381, %387 : vector<8x32xf32>
    %389 = vector.broadcast %13 : f32 to vector<8x32xf32>
    %390 = arith.mulf %388, %389 : vector<8x32xf32>
    %391 = vector.broadcast %5 : f32 to vector<8x32xf32>
    %392 = arith.addf %390, %391 : vector<8x32xf32>
    %c1_176 = arith.constant 1 : index
    %393 = memref.load %arg6[%c1_176] : memref<2xf32, #tpu.memory_space<smem>>
    %394 = vector.broadcast %393 : f32 to vector<8x32xf32>
    %395 = arith.addf %385, %394 : vector<8x32xf32>
    %396 = vector.broadcast %15 : f32 to vector<8x32xf32>
    %397 = arith.mulf %395, %396 : vector<8x32xf32>
    %398 = vector.broadcast %7 : f32 to vector<8x32xf32>
    %399 = arith.addf %397, %398 : vector<8x32xf32>
    %400 = vector.shape_cast %392 : vector<8x32xf32> to vector<1x8x32xf32>
    %401 = vector.shape_cast %400 : vector<1x8x32xf32> to vector<1x8x32xf32>
    %402 = vector.broadcast %401 : vector<1x8x32xf32> to vector<4x8x32xf32>
    %403 = vector.shape_cast %399 : vector<8x32xf32> to vector<1x8x32xf32>
    %404 = vector.shape_cast %403 : vector<1x8x32xf32> to vector<1x8x32xf32>
    %405 = vector.broadcast %404 : vector<1x8x32xf32> to vector<4x8x32xf32>
    %c0_177 = arith.constant 0 : index
    %c0_178 = arith.constant 0 : index
    %c0_179 = arith.constant 0 : index
    %c0_180 = arith.constant 0 : index
    %406 = vector.load %arg9[%c0_177, %c0_178, %c0_179, %c0_180] : memref<1x4x8x32xf32, #tpu.memory_space<vmem>>, vector<1x4x8x32xf32>
    %407 = vector.shape_cast %406 : vector<1x4x8x32xf32> to vector<4x8x32xf32>
    %c0_181 = arith.constant 0 : index
    %c0_182 = arith.constant 0 : index
    %c0_183 = arith.constant 0 : index
    %c0_184 = arith.constant 0 : index
    %408 = vector.load %arg10[%c0_181, %c0_182, %c0_183, %c0_184] : memref<1x4x8x32xf32, #tpu.memory_space<vmem>>, vector<1x4x8x32xf32>
    %409 = vector.shape_cast %408 : vector<1x4x8x32xf32> to vector<4x8x32xf32>
    %410 = arith.mulf %402, %407 : vector<4x8x32xf32>
    %411 = arith.mulf %405, %409 : vector<4x8x32xf32>
    %412 = arith.subf %410, %411 : vector<4x8x32xf32>
    %413 = vector.shape_cast %412 : vector<4x8x32xf32> to vector<1x4x8x32xf32>
    %c0_185 = arith.constant 0 : index
    %c0_186 = arith.constant 0 : index
    %c0_187 = arith.constant 0 : index
    %c0_188 = arith.constant 0 : index
    %414 = vector.load %arg11[%c0_185, %c0_186, %c0_187, %c0_188] : memref<1x4x8x32xf32, #tpu.memory_space<vmem>>, vector<1x4x8x32xf32>
    tpu.vector_store %arg11[%c0_185, %c0_186, %c0_187, %c0_188], %413 {strides = array<i32>} : memref<1x4x8x32xf32, #tpu.memory_space<vmem>>, vector<1x4x8x32xf32>,
    %415 = arith.mulf %402, %409 : vector<4x8x32xf32>
    %416 = arith.mulf %405, %407 : vector<4x8x32xf32>
    %417 = arith.addf %415, %416 : vector<4x8x32xf32>
    %418 = vector.shape_cast %417 : vector<4x8x32xf32> to vector<1x4x8x32xf32>
    %c0_189 = arith.constant 0 : index
    %c0_190 = arith.constant 0 : index
    %c0_191 = arith.constant 0 : index
    %c0_192 = arith.constant 0 : index
    %419 = vector.load %arg12[%c0_189, %c0_190, %c0_191, %c0_192] : memref<1x4x8x32xf32, #tpu.memory_space<vmem>>, vector<1x4x8x32xf32>
    tpu.vector_store %arg12[%c0_189, %c0_190, %c0_191, %c0_192], %418 {strides = array<i32>} : memref<1x4x8x32xf32, #tpu.memory_space<vmem>>, vector<1x4x8x32xf32>,
    return
  }
  func.func @transform_0(%arg0: i32, %arg1: i32) -> (i32, i32) {
    %c0_i32 = arith.constant 0 : i32
    %c0_i32_0 = arith.constant 0 : i32
    %c0_i32_1 = arith.constant 0 : i32
    return %c0_i32, %c0_i32_0 : i32, i32
  }
  func.func @transform_1(%arg0: i32, %arg1: i32) -> (i32, i32) {
    %c0_i32 = arith.constant 0 : i32
    %c0_i32_0 = arith.constant 0 : i32
    %c0_i32_1 = arith.constant 0 : i32
    return %c0_i32, %c0_i32_0 : i32, i32
  }
  func.func @transform_2(%arg0: i32, %arg1: i32) -> i32 {
    %c0_i32 = arith.constant 0 : i32
    %c0_i32_0 = arith.constant 0 : i32
    return %c0_i32 : i32
  }
  func.func @transform_3(%arg0: i32, %arg1: i32) -> (i32, i32) {
    %c0_i32 = arith.constant 0 : i32
    %c0_i32_0 = arith.constant 0 : i32
    %c0_i32_1 = arith.constant 0 : i32
    return %c0_i32, %c0_i32_0 : i32, i32
  }
  func.func @transform_4(%arg0: i32, %arg1: i32) -> i32 {
    %c0_i32 = arith.constant 0 : i32
    %c0_i32_0 = arith.constant 0 : i32
    return %c0_i32 : i32
  }
  func.func @transform_5(%arg0: i32, %arg1: i32) -> (i32, i32, i32) {
    %c0_i32 = arith.constant 0 : i32
    %c0_i32_0 = arith.constant 0 : i32
    return %arg0, %c0_i32, %arg1 : i32, i32, i32
  }
  func.func @transform_6(%arg0: i32, %arg1: i32) -> (i32, i32, i32) {
    %c0_i32 = arith.constant 0 : i32
    %c0_i32_0 = arith.constant 0 : i32
    return %arg0, %c0_i32, %arg1 : i32, i32, i32
  }
  func.func @transform_7(%arg0: i32, %arg1: i32) -> (i32, i32, i32, i32) {
    %c0_i32 = arith.constant 0 : i32
    %c0_i32_0 = arith.constant 0 : i32
    %c0_i32_1 = arith.constant 0 : i32
    return %arg0, %c0_i32, %c0_i32_0, %arg1 : i32, i32, i32, i32
  }
  func.func @transform_8(%arg0: i32, %arg1: i32) -> (i32, i32, i32, i32) {
    %c0_i32 = arith.constant 0 : i32
    %c0_i32_0 = arith.constant 0 : i32
    %c0_i32_1 = arith.constant 0 : i32
    return %arg0, %c0_i32, %c0_i32_0, %arg1 : i32, i32, i32, i32
  }
  func.func @transform_9(%arg0: i32, %arg1: i32) -> (i32, i32, i32, i32) {
    %c0_i32 = arith.constant 0 : i32
    %c0_i32_0 = arith.constant 0 : i32
    %c0_i32_1 = arith.constant 0 : i32
    return %arg0, %c0_i32, %c0_i32_0, %arg1 : i32, i32, i32, i32
  }
  func.func @transform_10(%arg0: i32, %arg1: i32) -> (i32, i32, i32, i32) {
    %c0_i32 = arith.constant 0 : i32
    %c0_i32_0 = arith.constant 0 : i32
    %c0_i32_1 = arith.constant 0 : i32
    return %arg0, %c0_i32, %c0_i32_0, %arg1 : i32, i32, i32, i32
  }
}

module attributes {stable_mosaic.version = 11 : i64} {
  func.func @_dc_kernel(%arg0: i32, %arg1: i32, %arg2: memref<1xf32, #tpu.memory_space<smem>>, %arg3: memref<1x1x256xf32, #tpu.memory_space<vmem>>, %arg4: memref<1x4x256xf32, #tpu.memory_space<vmem>>, %arg5: memref<1x4x256xf32, #tpu.memory_space<vmem>>, %arg6: memref<1x4x256xf32, #tpu.memory_space<vmem>>, %arg7: memref<1x4x256xf32, #tpu.memory_space<vmem>>, %arg8: memref<1x4x256xf32, #tpu.memory_space<vmem>>, %arg9: memref<1x4x256xf32, #tpu.memory_space<vmem>>, %arg10: memref<1x4x256xf32, #tpu.memory_space<vmem>>, %arg11: memref<1x4x256xf32, #tpu.memory_space<vmem>>) attributes {dimension_semantics = [#tpu.dimension_semantics<parallel>, #tpu.dimension_semantics<parallel>], iteration_bounds = array<i64: 2, 1>, scalar_prefetch = 0 : i64, scratch_operands = 0 : i64, tpu.core_type = #tpu.core_type<tc>, window_params = [{transform_indices = @transform_0, window_bounds = array<i64: 1>}, {transform_indices = @transform_1, window_bounds = array<i64: 1, 1, 256>}, {transform_indices = @transform_2, window_bounds = array<i64: 1, 4, 256>}, {transform_indices = @transform_3, window_bounds = array<i64: 1, 4, 256>}, {transform_indices = @transform_4, window_bounds = array<i64: 1, 4, 256>}, {transform_indices = @transform_5, window_bounds = array<i64: 1, 4, 256>}, {transform_indices = @transform_6, window_bounds = array<i64: 1, 4, 256>}, {transform_indices = @transform_7, window_bounds = array<i64: 1, 4, 256>}, {transform_indices = @transform_8, window_bounds = array<i64: 1, 4, 256>}, {transform_indices = @transform_9, window_bounds = array<i64: 1, 4, 256>}]} {
    %c0 = arith.constant 0 : index
    %0 = memref.load %arg2[%c0] : memref<1xf32, #tpu.memory_space<smem>>
    %c0_0 = arith.constant 0 : index
    %c0_1 = arith.constant 0 : index
    %c0_2 = arith.constant 0 : index
    %1 = vector.load %arg3[%c0_0, %c0_1, %c0_2] : memref<1x1x256xf32, #tpu.memory_space<vmem>>, vector<1x1x256xf32>
    %c0_3 = arith.constant 0 : index
    %c0_4 = arith.constant 0 : index
    %c0_5 = arith.constant 0 : index
    %2 = vector.load %arg4[%c0_3, %c0_4, %c0_5] : memref<1x4x256xf32, #tpu.memory_space<vmem>>, vector<1x4x256xf32>
    %c0_6 = arith.constant 0 : index
    %c0_7 = arith.constant 0 : index
    %c0_8 = arith.constant 0 : index
    %3 = vector.load %arg5[%c0_6, %c0_7, %c0_8] : memref<1x4x256xf32, #tpu.memory_space<vmem>>, vector<1x4x256xf32>
    %c0_9 = arith.constant 0 : index
    %c0_10 = arith.constant 0 : index
    %c0_11 = arith.constant 0 : index
    %4 = vector.load %arg6[%c0_9, %c0_10, %c0_11] : memref<1x4x256xf32, #tpu.memory_space<vmem>>, vector<1x4x256xf32>
    %5 = arith.subf %2, %4 : vector<1x4x256xf32>
    %6 = vector.broadcast %1 : vector<1x1x256xf32> to vector<1x4x256xf32>
    %7 = arith.mulf %6, %5 : vector<1x4x256xf32>
    %8 = vector.broadcast %0 : f32 to vector<1x4x256xf32>
    %9 = arith.mulf %7, %8 : vector<1x4x256xf32>
    %10 = arith.subf %2, %9 : vector<1x4x256xf32>
    %c0_12 = arith.constant 0 : index
    %c0_13 = arith.constant 0 : index
    %c0_14 = arith.constant 0 : index
    %11 = vector.load %arg8[%c0_12, %c0_13, %c0_14] : memref<1x4x256xf32, #tpu.memory_space<vmem>>, vector<1x4x256xf32>
    %12 = arith.subf %10, %11 : vector<1x4x256xf32>
    %c0_15 = arith.constant 0 : index
    %c0_16 = arith.constant 0 : index
    %c0_17 = arith.constant 0 : index
    %13 = vector.load %arg10[%c0_15, %c0_16, %c0_17] : memref<1x4x256xf32, #tpu.memory_space<vmem>>, vector<1x4x256xf32>
    tpu.vector_store %arg10[%c0_15, %c0_16, %c0_17], %12 {strides = array<i32>} : memref<1x4x256xf32, #tpu.memory_space<vmem>>, vector<1x4x256xf32>,
    %c0_18 = arith.constant 0 : index
    %c0_19 = arith.constant 0 : index
    %c0_20 = arith.constant 0 : index
    %14 = vector.load %arg7[%c0_18, %c0_19, %c0_20] : memref<1x4x256xf32, #tpu.memory_space<vmem>>, vector<1x4x256xf32>
    %15 = arith.subf %3, %14 : vector<1x4x256xf32>
    %16 = vector.broadcast %1 : vector<1x1x256xf32> to vector<1x4x256xf32>
    %17 = arith.mulf %16, %15 : vector<1x4x256xf32>
    %18 = vector.broadcast %0 : f32 to vector<1x4x256xf32>
    %19 = arith.mulf %17, %18 : vector<1x4x256xf32>
    %20 = arith.subf %3, %19 : vector<1x4x256xf32>
    %c0_21 = arith.constant 0 : index
    %c0_22 = arith.constant 0 : index
    %c0_23 = arith.constant 0 : index
    %21 = vector.load %arg9[%c0_21, %c0_22, %c0_23] : memref<1x4x256xf32, #tpu.memory_space<vmem>>, vector<1x4x256xf32>
    %22 = arith.subf %20, %21 : vector<1x4x256xf32>
    %c0_24 = arith.constant 0 : index
    %c0_25 = arith.constant 0 : index
    %c0_26 = arith.constant 0 : index
    %23 = vector.load %arg11[%c0_24, %c0_25, %c0_26] : memref<1x4x256xf32, #tpu.memory_space<vmem>>, vector<1x4x256xf32>
    tpu.vector_store %arg11[%c0_24, %c0_25, %c0_26], %22 {strides = array<i32>} : memref<1x4x256xf32, #tpu.memory_space<vmem>>, vector<1x4x256xf32>,
    return
  }
  func.func @transform_0(%arg0: i32, %arg1: i32) -> i32 {
    %c0_i32 = arith.constant 0 : i32
    %c0_i32_0 = arith.constant 0 : i32
    return %c0_i32 : i32
  }
  func.func @transform_1(%arg0: i32, %arg1: i32) -> (i32, i32, i32) {
    %c0_i32 = arith.constant 0 : i32
    %c0_i32_0 = arith.constant 0 : i32
    return %arg0, %c0_i32, %arg1 : i32, i32, i32
  }
  func.func @transform_2(%arg0: i32, %arg1: i32) -> (i32, i32, i32) {
    %c0_i32 = arith.constant 0 : i32
    %c0_i32_0 = arith.constant 0 : i32
    return %arg0, %c0_i32, %arg1 : i32, i32, i32
  }
  func.func @transform_3(%arg0: i32, %arg1: i32) -> (i32, i32, i32) {
    %c0_i32 = arith.constant 0 : i32
    %c0_i32_0 = arith.constant 0 : i32
    return %arg0, %c0_i32, %arg1 : i32, i32, i32
  }
  func.func @transform_4(%arg0: i32, %arg1: i32) -> (i32, i32, i32) {
    %c0_i32 = arith.constant 0 : i32
    %c0_i32_0 = arith.constant 0 : i32
    return %arg0, %c0_i32, %arg1 : i32, i32, i32
  }
  func.func @transform_5(%arg0: i32, %arg1: i32) -> (i32, i32, i32) {
    %c0_i32 = arith.constant 0 : i32
    %c0_i32_0 = arith.constant 0 : i32
    return %arg0, %c0_i32, %arg1 : i32, i32, i32
  }
  func.func @transform_6(%arg0: i32, %arg1: i32) -> (i32, i32, i32) {
    %c0_i32 = arith.constant 0 : i32
    %c0_i32_0 = arith.constant 0 : i32
    return %arg0, %c0_i32, %arg1 : i32, i32, i32
  }
  func.func @transform_7(%arg0: i32, %arg1: i32) -> (i32, i32, i32) {
    %c0_i32 = arith.constant 0 : i32
    %c0_i32_0 = arith.constant 0 : i32
    return %arg0, %c0_i32, %arg1 : i32, i32, i32
  }
  func.func @transform_8(%arg0: i32, %arg1: i32) -> (i32, i32, i32) {
    %c0_i32 = arith.constant 0 : i32
    %c0_i32_0 = arith.constant 0 : i32
    return %arg0, %c0_i32, %arg1 : i32, i32, i32
  }
  func.func @transform_9(%arg0: i32, %arg1: i32) -> (i32, i32, i32) {
    %c0_i32 = arith.constant 0 : i32
    %c0_i32_0 = arith.constant 0 : i32
    return %arg0, %c0_i32, %arg1 : i32, i32, i32
  }
}

</mosaic_0001>

<bundles_post_ra>
// kernel: squeeze.8
= control target key start
LH: loop header
LB: loop body
LE: loop exit
PB: predicated region body
PF: predicated region fallthrough
CT: control target
= control target key end

     0   :  { %vm35_vm0 = vcmask 1043458   ;;  %vm40_vm1 = vcmask 1045508   ;;  %vm45_vm2 = vcmask 1047558   ;;  %s79_s6 = smov 3  ;;  %s82_s7 = smov 12  ;;  %vm4_vm3 = vcmask 1047556   ;;  %s726_s0 = inlined_call_operand.vmem [shape: f32[2,4,16,16], index: 0, kind: input, shape index: {}]   ;;  %s727_s1 = inlined_call_operand.vmem [shape: f32[2,4,256], index: 1, kind: output, shape index: {}]  }
   0x1   :  { %v406_v0 = vld [vmem:[%s726_s0 + $0x6] ss:$16 sm:%s79_s6]   ;;  %s87_s12 = smov 48  ;;  %s92_s13 = smov 192  ;;  %vm6_vm4 = vcmask 130048   ;;  %vm49_vm5 = vcmask 1048448  }
   0x2   :  { %v407_v1 = vld [vmem:[%s726_s0 + $0x6] ss:$16 sm:%s82_s7]   ;;  %v408_v3 = vld [vmem:[%s726_s0 - $0x32] ss:$16 sm:%s87_s12]   ;;  %s30_s18 = smov 3  ;;  %s33_s21 = smov 12 }
   0x3   :  { %v85_v2 = vsel %vm35_vm0, %v407_v1, %v406_v0  ;;  %v409_v4 = vld [vmem:[%s726_s0 - $0x32] ss:$16 sm:%s92_s13]   ;;  %v398_v6 = vld [vmem:[%s726_s0 + $0x7] ss:$16 sm:%s30_s18]   ;;  %s38_s22 = smov 48  ;;  %s43_s27 = smov 192 }
   0x4   :  { %v90_v5 = vsel %vm40_vm1, %v408_v3, %v85_v2  ;;  %v399_v8 = vld [vmem:[%s726_s0 + $0x7] ss:$16 sm:%s33_s21]   ;;  %v400_v9 = vld [vmem:[%s726_s0 - $0x31] ss:$16 sm:%s38_s22]   ;;  %s464_s28 = smov 96   ;;  %s103_s2 = smov 3 }
   0x5   :  { %v95_v7 = vsel %vm45_vm2, %v409_v4, %v90_v5  ;;  %v36_v10 = vsel %vm35_vm0, %v399_v8, %v398_v6  ;;  %v401_v11 = vld [vmem:[%s726_s0 - $0x31] ss:$16 sm:%s43_s27]   ;;  %s106_s3 = smov 12  ;;  %v410_v13 = vld [vmem:[%s726_s0 + $0x46] ss:$16 sm:%s103_s2]   ;;  %s111_s8 = smov 48 }
   0x6   :  { %96 = vrot.lane.b32.xlu1 %v95_v7, %s464_s28  ;;  %v41_v12 = vsel %vm40_vm1, %v400_v9, %v36_v10  ;;  %v411_v14 = vld [vmem:[%s726_s0 + $0x46] ss:$16 sm:%s106_s3]   ;;  %s116_s9 = smov 192  ;;  %s54_s14 = smov 3  ;;  %vm98_vm6 = vcmask 917248   ;;  %vm147_vm7 = vcmask 786048  }
   0x7   :  { %v46_v15 = vsel %vm45_vm2, %v401_v11, %v41_v12  ;;  %v109_v16 = vsel %vm35_vm0, %v411_v14, %v410_v13  ;;  %v412_v17 = vld [vmem:[%s726_s0 + $0xe] ss:$16 sm:%s111_s8]   ;;  %s57_s15 = smov 12  ;;  %s465_s16 = smov 112   ;;  %v402_v20 = vld [vmem:[%s726_s0 + $0x47] ss:$16 sm:%s54_s14]  }
   0x8   :  { %v413_v18 = vld [vmem:[%s726_s0 + $0xe] ss:$16 sm:%s116_s9]   ;;  %47 = vrot.lane.b32.xlu0 %v46_v15, %s465_s16  ;;  %v114_v19 = vsel %vm40_vm1, %v412_v17, %v109_v16  ;;  %s62_s19 = smov 48  ;;  %s67_s20 = smov 192  ;;  %vm196_vm8 = vcmask 654848   ;;  %vm245_vm9 = vcmask 523648  }
   0x9   :  { %v403_v21 = vld [vmem:[%s726_s0 + $0x47] ss:$16 sm:%s57_s15]   ;;  %v404_v22 = vld [vmem:[%s726_s0 + $0xf] ss:$16 sm:%s62_s19]   ;;  %s201_s25 = smov 3  ;;  %v119_v23 = vsel %vm45_vm2, %v413_v18, %v114_v19  ;;  %s204_s2 = smov 12 }
   0xa   :  { %v60_v24 = vsel %vm35_vm0, %v403_v21, %v402_v20  ;;  %v405_v25 = vld [vmem:[%s726_s0 + $0xf] ss:$16 sm:%s67_s20]   ;;  %v426_v26 = vld [vmem:[%s726_s0 + $0x44] ss:$16 sm:%s201_s25]   ;;  %s209_s3 = smov 48  ;;  %s214_s6 = smov 192 }
   0xb   :  { %v65_v27 = vsel %vm40_vm1, %v404_v22, %v60_v24  ;;  %v427_v28 = vld [vmem:[%s726_s0 + $0x44] ss:$16 sm:%s204_s2]   ;;  %s177_s7 = smov 3  ;;  %v428_v30 = vld [vmem:[%s726_s0 + $0xc] ss:$16 sm:%s209_s3]   ;;  %s180_s12 = smov 12 }
   0xc   :  { %v207_v29 = vsel %vm35_vm0, %v427_v28, %v426_v26  ;;  %v422_v31 = vld [vmem:[%s726_s0 + $0x4] ss:$16 sm:%s177_s7]   ;;  %s185_s13 = smov 48  ;;  %v70_v32 = vsel %vm45_vm2, %v405_v25, %v65_v27  ;;  %s190_s15 = smov 192  ;;  %v429_v35 = vld [vmem:[%s726_s0 + $0xc] ss:$16 sm:%s214_s6]  }
   0xd   :  { %v423_v33 = vld [vmem:[%s726_s0 + $0x4] ss:$16 sm:%s180_s12]   ;;  %s275_s17 = smov 3  ;;  %s278_s18 = smov 12  ;;  %v212_v34 = vsel %vm40_vm1, %v428_v30, %v207_v29  ;;  %v424_v37 = vld [vmem:[%s726_s0 - $0x34] ss:$16 sm:%s185_s13]  }
   0xe   :  { %120 = vrot.lane.b32.xlu1 %v119_v23, %s464_s28  ;;  %v183_v36 = vsel %vm35_vm0, %v423_v33, %v422_v31  ;;  %s283_s23 = smov 48  ;;  %v425_v38 = vld [vmem:[%s726_s0 - $0x34] ss:$16 sm:%s190_s15]   ;;  %s250_s25 = smov 3  ;;  %v217_v41 = vsel %vm45_vm2, %v429_v35, %v212_v34  ;;  %vm294_vm10 = vcmask 392448   ;;  %vm343_vm11 = vcmask 261248  }
   0xf   :  { %v438_v39 = vld [vmem:[%s726_s0 + $0x2] ss:$16 sm:%s275_s17]   ;;  %s288_s2 = smov 192  ;;  %s253_s3 = smov 12  ;;  %v188_v42 = vsel %vm40_vm1, %v424_v37, %v183_v36  ;;  %v440_v43 = vld [vmem:[%s726_s0 - $0x36] ss:$16 sm:%s283_s23]  }
  0x10   :  { %71 = vrot.lane.b32.xlu0 %v70_v32, %s465_s16  ;;  %v439_v40 = vld [vmem:[%s726_s0 + $0x2] ss:$16 sm:%s278_s18]   ;;  %s128_s8 = smov 3  ;;  %s131_s13 = smov 12  ;;  %v193_v50 = vsel %vm45_vm2, %v425_v38, %v188_v42 }
  0x11   :  { %v434_v44 = vld [vmem:[%s726_s0 + $0x43] ss:$16 sm:%s250_s25]   ;;  %v414_v46 = vld [vmem:[%s726_s0 + $0x5] ss:$16 sm:%s128_s8]   ;;  %s136_s28 = smov 48  ;;  %v281_v47 = vsel %vm35_vm0, %v439_v40, %v438_v39  ;;  %s258_s14 = smov 48 }
  0x12   :  { %v435_v45 = vld [vmem:[%s726_s0 + $0x43] ss:$16 sm:%s253_s3]   ;;  %v415_v48 = vld [vmem:[%s726_s0 + $0x5] ss:$16 sm:%s131_s13]   ;;  %s141_s20 = smov 192  ;;  %s466_s21 = smov 64   ;;  %v286_v54 = vsel %vm40_vm1, %v440_v43, %v281_v47 }
  0x13   :  { %v416_v49 = vld [vmem:[%s726_s0 - $0x33] ss:$16 sm:%s136_s28]   ;;  %s263_s22 = smov 192  ;;  %v134_v51 = vsel %vm35_vm0, %v415_v48, %v414_v46  ;;  %s348_s24 = smov 3  ;;  %v441_v55 = vld [vmem:[%s726_s0 - $0x36] ss:$16 sm:%s288_s2]   ;;  %v256_v56 = vsel %vm35_vm0, %v435_v45, %v434_v44 }
  0x14   :  { %v417_v52 = vld [vmem:[%s726_s0 - $0x33] ss:$16 sm:%s141_s20]   ;;  %v139_v53 = vsel %vm40_vm1, %v416_v49, %v134_v51  ;;  %s351_s25 = smov 12  ;;  %v436_v57 = vld [vmem:[%s726_s0 + $0xb] ss:$16 sm:%s258_s14]   ;;  %s356_s2 = smov 48  ;;  %v291_v62 = vsel %vm45_vm2, %v441_v55, %v286_v54 }
  0x15   :  { %v144_v58 = vsel %vm45_vm2, %v417_v52, %v139_v53  ;;  %s324_s3 = smov 3  ;;  %v437_v59 = vld [vmem:[%s726_s0 + $0xb] ss:$16 sm:%s263_s22]   ;;  %s467_s6 = smov 80   ;;  %v450_v60 = vld [vmem:[%s726_s0 + $0x41] ss:$16 sm:%s348_s24]   ;;  %v261_v63 = vsel %vm40_vm1, %v436_v57, %v256_v56 }
  0x16   :  { %218 = vrot.lane.b32.xlu1 %v217_v41, %s466_s21  ;;  %145 = vrot.lane.b32.xlu2 %v144_v58, %s467_s6  ;;  %s361_s7 = smov 192  ;;  %s327_s8 = smov 12  ;;  %v451_v61 = vld [vmem:[%s726_s0 + $0x41] ss:$16 sm:%s351_s25]   ;;  %v266_v9 = vsel %vm45_vm2, %v437_v59, %v261_v63 }
  0x17   :  { %s624_s13 = smov 48  ;;  %s152_s28 = smov 3  ;;  %v452_v0 = vld [vmem:[%s726_s0 + $0x9] ss:$16 sm:%s356_s2]   ;;  %v446_v1 = vld [vmem:[%s726_s0 + $0x1] ss:$16 sm:%s324_s3]   ;;  %v354_v5 = vsel %vm35_vm0, %v451_v61, %v450_v60 }
  0x18   :  { %194 = vrot.lane.b32.xlu0 %v193_v50, %s466_s21  ;;  %v447_v2 = vld [vmem:[%s726_s0 + $0x1] ss:$16 sm:%s327_s8]   ;;  %s155_s21 = smov 12  ;;  %s160_s22 = smov 48  ;;  %v359_v15 = vsel %vm40_vm1, %v452_v0, %v354_v5 }
  0x19   :  { %v418_v3 = vld [vmem:[%s726_s0 + $0x45] ss:$16 sm:%s152_s28]   ;;  %s165_s26 = smov 192  ;;  %s226_s27 = smov 3  ;;  %v420_v7 = vld [vmem:[%s726_s0 + $0xd] ss:$16 sm:%s160_s22]   ;;  %v330_v16 = vsel %vm35_vm0, %v447_v2, %v446_v1 }
  0x1a   :  { %v419_v4 = vld [vmem:[%s726_s0 + $0x45] ss:$16 sm:%s155_s21]   ;;  %v421_v8 = vld [vmem:[%s726_s0 + $0xd] ss:$16 sm:%s165_s26]   ;;  %s229_s4 = smov 12  ;;  %s234_s5 = smov 48 }
  0x1b   :  { %v158_v6 = vsel %vm35_vm0, %v419_v4, %v418_v3  ;;  %s468_s8 = smov 32   ;;  %v430_v11 = vld [vmem:[%s726_s0 + $0x3] ss:$16 sm:%s226_s27]   ;;  %v453_v12 = vld [vmem:[%s726_s0 + $0x9] ss:$16 sm:%s361_s7]   ;;  %s239_s19 = smov 192 }
  0x1c   :  { %v163_v10 = vsel %vm40_vm1, %v420_v7, %v158_v6  ;;  %v431_v14 = vld [vmem:[%s726_s0 + $0x3] ss:$16 sm:%s229_s4]   ;;  %v448_v17 = vld [vmem:[%s726_s0 - $0x37] ss:$16 sm:%s624_s13]   ;;  %s337_s13 = smov 192  ;;  %s469_s20 = smov 48   ;;  %v364_v20 = vsel %vm45_vm2, %v453_v12, %v359_v15 }
  0x1d   :  { %v168_v13 = vsel %vm45_vm2, %v421_v8, %v163_v10  ;;  %v232_v18 = vsel %vm35_vm0, %v431_v14, %v430_v11  ;;  %v432_v19 = vld [vmem:[%s726_s0 - $0x35] ss:$16 sm:%s234_s5]   ;;  %s302_s21 = smov 12  ;;  %v335_v21 = vsel %vm40_vm1, %v448_v17, %v330_v16  ;;  %v449_v22 = vld [vmem:[%s726_s0 - $0x37] ss:$16 sm:%s337_s13]   ;;  %s307_s30 = smov 48 }
  0x1e   :  { %292 = vrot.lane.b32.xlu1 %v291_v62, %s468_s8  ;;  %169 = vrot.lane.b32.xlu2 %v168_v13, %s467_s6  ;;  %s299_s6 = smov 3  ;;  %v237_v23 = vsel %vm40_vm1, %v432_v19, %v232_v18  ;;  %v433_v24 = vld [vmem:[%s726_s0 - $0x35] ss:$16 sm:%s239_s19]   ;;  %s470_s2 = smov 16   ;;  %v340_v27 = vsel %vm45_vm2, %v449_v22, %v335_v21 }
  0x1f   :  { %v442_v25 = vld [vmem:[%s726_s0 + $0x42] ss:$16 sm:%s299_s6]   ;;  %v242_v28 = vsel %vm45_vm2, %v433_v24, %v237_v23  ;;  %v444_v30 = vld [vmem:[%s726_s0 + $0xa] ss:$16 sm:%s307_s30]   ;;  %s312_s5 = smov 192 }
  0x20   :  { %267 = vrot.lane.b32.xlu0 %v266_v9, %s469_s20  ;;  %v443_v26 = vld [vmem:[%s726_s0 + $0x42] ss:$16 sm:%s302_s21]   ;;  %v2_v34 = vld [vmem:[%s726_s0] ss:$8 sm:$0xf]  }
  0x21   :  { %v305_v29 = vsel %vm35_vm0, %v443_v26, %v442_v25  ;;  %v445_v32 = vld [vmem:[%s726_s0 + $0xa] ss:$16 sm:%s312_s5]   ;;  %v3_v35 = vld [vmem:[%s726_s0] ss:$8 sm:$0xf0]  }
  0x22   :  { %v310_v31 = vsel %vm40_vm1, %v444_v30, %v305_v29  ;;  %v5_v36 = vsel %vm4_vm3, %v3_v35, %v2_v34  ;;  %v396_v37 = vld [vmem:[%s726_s0 + $0x40] ss:$8 sm:$0xf]  }
  0x23   :  { %v315_v33 = vsel %vm45_vm2, %v445_v32, %v310_v31  ;;  %7 = vst.msk [vmem:[#allocation0] ss:$8 sm:$0x3] %vm6_vm4, %v5_v36   ;;  %v397_v38 = vld [vmem:[%s726_s0 + $0x40] ss:$8 sm:$0xf0]  }
  0x24   :  { %9 = vst.msk [vmem:[#allocation0 - $0xf] ss:$8 sm:$0xc] %vm6_vm4, %v5_v36   ;;  %v19_v39 = vsel %vm4_vm3, %v397_v38, %v396_v37 }
  0x25   :  { %11 = vst.msk [vmem:[#allocation0 - $0x1e] ss:$8 sm:$0x30] %vm6_vm4, %v5_v36  }
  0x26   :  { %365 = vrot.lane.b32.xlu1 %v364_v20, %s470_s2  ;;  %243 = vrot.lane.b32.xlu2 %v242_v28, %s469_s20  ;;  %13 = vst.msk [vmem:[#allocation0 - $0x2d] ss:$8 sm:$0xc0] %vm6_vm4, %v5_v36  }
  0x27   :  { %22 = vst.msk [vmem:[#allocation0 + $0x10] ss:$8 sm:$0x3] %vm6_vm4, %v19_v39  }
  0x28   :  { %341 = vrot.lane.b32.xlu0 %v340_v27, %s470_s2  ;;  %24 = vst.msk [vmem:[#allocation0 + $0x1] ss:$8 sm:$0xc] %vm6_vm4, %v19_v39  }
  0x29   :  { %26 = vst.msk [vmem:[#allocation0 - $0xe] ss:$8 sm:$0x30] %vm6_vm4, %v19_v39  }
  0x2a   :  { %28 = vst.msk [vmem:[#allocation0 - $0x1d] ss:$8 sm:$0xc0] %vm6_vm4, %v19_v39  }
  0x2e   :  { %316 = vrot.lane.b32.xlu2 %v315_v33, %s468_s8 }
  0x70   :  { %v146_v40 = vpop.permute.xlu2 %145  }
  0x78   :  { %v97_v41 = vpop.permute.xlu1 %96   ;;  %v170_v43 = vpop.permute.xlu2 %169  }
  0x7a   :  { %v48_v42 = vpop.permute.xlu0 %47  }
  0x7b   :  { %50 = vst.msk [vmem:[#allocation0] sm:$0xf] %vm49_vm5, %v48_v42  }
  0x7c   :  { %52 = vst.msk [vmem:[#allocation0 + $0x4] sm:$0xf0] %vm49_vm5, %v48_v42  }
  0x7d   :  { %99 = vst.msk [vmem:[#allocation0] sm:$0xf] %vm98_vm6, %v97_v41  }
  0x7e   :  { %101 = vst.msk [vmem:[#allocation0 + $0x4] sm:$0xf0] %vm98_vm6, %v97_v41  }
  0x7f   :  { %148 = vst.msk [vmem:[#allocation0] sm:$0xf] %vm147_vm7, %v146_v40  }
  0x80   :  { %v121_v44 = vpop.permute.xlu1 %120   ;;  %150 = vst.msk [vmem:[#allocation0 + $0x4] sm:$0xf0] %vm147_vm7, %v146_v40   ;;  %v244_v46 = vpop.permute.xlu2 %243  }
  0x82   :  { %v72_v45 = vpop.permute.xlu0 %71  }
  0x83   :  { %75 = vst.msk [vmem:[#allocation0 + $0x10] sm:$0xf] %vm49_vm5, %v72_v45  }
  0x84   :  { %77 = vst.msk [vmem:[#allocation0 + $0x14] sm:$0xf0] %vm49_vm5, %v72_v45  }
  0x85   :  { %124 = vst.msk [vmem:[#allocation0 + $0x10] sm:$0xf] %vm98_vm6, %v121_v44  }
  0x86   :  { %126 = vst.msk [vmem:[#allocation0 + $0x14] sm:$0xf0] %vm98_vm6, %v121_v44  }
  0x87   :  { %173 = vst.msk [vmem:[#allocation0 + $0x10] sm:$0xf] %vm147_vm7, %v170_v43  }
  0x88   :  { %v219_v47 = vpop.permute.xlu1 %218   ;;  %175 = vst.msk [vmem:[#allocation0 + $0x14] sm:$0xf0] %vm147_vm7, %v170_v43   ;;  %v317_v49 = vpop.permute.xlu2 %316  }
  0x89   :  { %222 = vst.msk [vmem:[#allocation0 + $0x10] sm:$0xf] %vm196_vm8, %v219_v47  }
  0x8a   :  { %224 = vst.msk [vmem:[#allocation0 + $0x14] sm:$0xf0] %vm196_vm8, %v219_v47   ;;  %v195_v48 = vpop.permute.xlu0 %194  }
  0x8b   :  { %197 = vst.msk [vmem:[#allocation0] sm:$0xf] %vm196_vm8, %v195_v48  }
  0x8c   :  { %199 = vst.msk [vmem:[#allocation0 + $0x4] sm:$0xf0] %vm196_vm8, %v195_v48  }
  0x8d   :  { %246 = vst.msk [vmem:[#allocation0] sm:$0xf] %vm245_vm9, %v244_v46  }
  0x8e   :  { %248 = vst.msk [vmem:[#allocation0 + $0x4] sm:$0xf0] %vm245_vm9, %v244_v46  }
  0x90   :  { %v293_v50 = vpop.permute.xlu1 %292  }
  0x91   :  { %295 = vst.msk [vmem:[#allocation0] sm:$0xf] %vm294_vm10, %v293_v50  }
  0x92   :  { %297 = vst.msk [vmem:[#allocation0 + $0x4] sm:$0xf0] %vm294_vm10, %v293_v50   ;;  %v268_v51 = vpop.permute.xlu0 %267  }
  0x93   :  { %271 = vst.msk [vmem:[#allocation0 + $0x10] sm:$0xf] %vm245_vm9, %v268_v51  }
  0x94   :  { %273 = vst.msk [vmem:[#allocation0 + $0x14] sm:$0xf0] %vm245_vm9, %v268_v51  }
  0x95   :  { %320 = vst.msk [vmem:[#allocation0 + $0x10] sm:$0xf] %vm294_vm10, %v317_v49  }
  0x96   :  { %322 = vst.msk [vmem:[#allocation0 + $0x14] sm:$0xf0] %vm294_vm10, %v317_v49  }
  0x98   :  { %v366_v52 = vpop.permute.xlu1 %365  }
  0x99   :  { %369 = vst.msk [vmem:[#allocation0 + $0x10] sm:$0xf] %vm343_vm11, %v366_v52  }
  0x9a   :  { %371 = vst.msk [vmem:[#allocation0 + $0x14] sm:$0xf0] %vm343_vm11, %v366_v52   ;;  %v342_v53 = vpop.permute.xlu0 %341  }
  0x9b   :  { %344 = vst.msk [vmem:[#allocation0] sm:$0xf] %vm343_vm11, %v342_v53  }
  0x9c   :  { %346 = vst.msk [vmem:[#allocation0 + $0x4] sm:$0xf0] %vm343_vm11, %v342_v53  }
  0xa0   :  { %v385_v54 = vld [vmem:[#allocation0 + $0x10] sm:$0xf] }
  0xa1   :  { %455 = vst [vmem:[%s727_s1 + $0x8] sm:$0xf] %v385_v54  ;;  %v391_v55 = vld [vmem:[#allocation0 + $0x18] sm:$0xf] }
  0xa2   :  { %456 = vst [vmem:[%s727_s1 + $0xc] sm:$0xf] %v391_v55  ;;  %v374_v56 = vld [vmem:[#allocation0] sm:$0xf] }
  0xa3   :  { %377 = vst [vmem:[%s727_s1] sm:$0xf] %v374_v56  ;;  %v379_v57 = vld [vmem:[#allocation0 + $0x8] sm:$0xf] }
  0xa4   :  { %454 = vst [vmem:[%s727_s1 + $0x4] sm:$0xf] %v379_v57 }

// kernel: squeeze.7
= control target key start
LH: loop header
LB: loop body
LE: loop exit
PB: predicated region body
PF: predicated region fallthrough
CT: control target
= control target key end

     0   :  { %vm35_vm0 = vcmask 1043458   ;;  %vm40_vm1 = vcmask 1045508   ;;  %vm45_vm2 = vcmask 1047558   ;;  %s79_s6 = smov 3  ;;  %s82_s7 = smov 12  ;;  %vm4_vm3 = vcmask 1047556   ;;  %s726_s0 = inlined_call_operand.vmem [shape: f32[2,4,16,16,1], index: 0, kind: input, shape index: {}]   ;;  %s727_s1 = inlined_call_operand.vmem [shape: f32[2,4,256], index: 1, kind: output, shape index: {}]  }
   0x1   :  { %v406_v0 = vld [vmem:[%s726_s0 + $0x6] ss:$16 sm:%s79_s6]   ;;  %s87_s12 = smov 48  ;;  %s92_s13 = smov 192  ;;  %vm6_vm4 = vcmask 130048   ;;  %vm49_vm5 = vcmask 1048448  }
   0x2   :  { %v407_v1 = vld [vmem:[%s726_s0 + $0x6] ss:$16 sm:%s82_s7]   ;;  %v408_v3 = vld [vmem:[%s726_s0 - $0x32] ss:$16 sm:%s87_s12]   ;;  %s30_s18 = smov 3  ;;  %s33_s21 = smov 12 }
   0x3   :  { %v85_v2 = vsel %vm35_vm0, %v407_v1, %v406_v0  ;;  %v409_v4 = vld [vmem:[%s726_s0 - $0x32] ss:$16 sm:%s92_s13]   ;;  %v398_v6 = vld [vmem:[%s726_s0 + $0x7] ss:$16 sm:%s30_s18]   ;;  %s38_s22 = smov 48  ;;  %s43_s27 = smov 192 }
   0x4   :  { %v90_v5 = vsel %vm40_vm1, %v408_v3, %v85_v2  ;;  %v399_v8 = vld [vmem:[%s726_s0 + $0x7] ss:$16 sm:%s33_s21]   ;;  %v400_v9 = vld [vmem:[%s726_s0 - $0x31] ss:$16 sm:%s38_s22]   ;;  %s464_s28 = smov 96   ;;  %s103_s2 = smov 3 }
   0x5   :  { %v95_v7 = vsel %vm45_vm2, %v409_v4, %v90_v5  ;;  %v36_v10 = vsel %vm35_vm0, %v399_v8, %v398_v6  ;;  %v401_v11 = vld [vmem:[%s726_s0 - $0x31] ss:$16 sm:%s43_s27]   ;;  %s106_s3 = smov 12  ;;  %v410_v13 = vld [vmem:[%s726_s0 + $0x46] ss:$16 sm:%s103_s2]   ;;  %s111_s8 = smov 48 }
   0x6   :  { %96 = vrot.lane.b32.xlu1 %v95_v7, %s464_s28  ;;  %v41_v12 = vsel %vm40_vm1, %v400_v9, %v36_v10  ;;  %v411_v14 = vld [vmem:[%s726_s0 + $0x46] ss:$16 sm:%s106_s3]   ;;  %s116_s9 = smov 192  ;;  %s54_s14 = smov 3  ;;  %vm98_vm6 = vcmask 917248   ;;  %vm147_vm7 = vcmask 786048  }
   0x7   :  { %v46_v15 = vsel %vm45_vm2, %v401_v11, %v41_v12  ;;  %v109_v16 = vsel %vm35_vm0, %v411_v14, %v410_v13  ;;  %v412_v17 = vld [vmem:[%s726_s0 + $0xe] ss:$16 sm:%s111_s8]   ;;  %s57_s15 = smov 12  ;;  %s465_s16 = smov 112   ;;  %v402_v20 = vld [vmem:[%s726_s0 + $0x47] ss:$16 sm:%s54_s14]  }
   0x8   :  { %v413_v18 = vld [vmem:[%s726_s0 + $0xe] ss:$16 sm:%s116_s9]   ;;  %47 = vrot.lane.b32.xlu0 %v46_v15, %s465_s16  ;;  %v114_v19 = vsel %vm40_vm1, %v412_v17, %v109_v16  ;;  %s62_s19 = smov 48  ;;  %s67_s20 = smov 192  ;;  %vm196_vm8 = vcmask 654848   ;;  %vm245_vm9 = vcmask 523648  }
   0x9   :  { %v403_v21 = vld [vmem:[%s726_s0 + $0x47] ss:$16 sm:%s57_s15]   ;;  %v404_v22 = vld [vmem:[%s726_s0 + $0xf] ss:$16 sm:%s62_s19]   ;;  %s201_s25 = smov 3  ;;  %v119_v23 = vsel %vm45_vm2, %v413_v18, %v114_v19  ;;  %s204_s2 = smov 12 }
   0xa   :  { %v60_v24 = vsel %vm35_vm0, %v403_v21, %v402_v20  ;;  %v405_v25 = vld [vmem:[%s726_s0 + $0xf] ss:$16 sm:%s67_s20]   ;;  %v426_v26 = vld [vmem:[%s726_s0 + $0x44] ss:$16 sm:%s201_s25]   ;;  %s209_s3 = smov 48  ;;  %s214_s6 = smov 192 }
   0xb   :  { %v65_v27 = vsel %vm40_vm1, %v404_v22, %v60_v24  ;;  %v427_v28 = vld [vmem:[%s726_s0 + $0x44] ss:$16 sm:%s204_s2]   ;;  %s177_s7 = smov 3  ;;  %v428_v30 = vld [vmem:[%s726_s0 + $0xc] ss:$16 sm:%s209_s3]   ;;  %s180_s12 = smov 12 }
   0xc   :  { %v207_v29 = vsel %vm35_vm0, %v427_v28, %v426_v26  ;;  %v422_v31 = vld [vmem:[%s726_s0 + $0x4] ss:$16 sm:%s177_s7]   ;;  %s185_s13 = smov 48  ;;  %v70_v32 = vsel %vm45_vm2, %v405_v25, %v65_v27  ;;  %s190_s15 = smov 192  ;;  %v429_v35 = vld [vmem:[%s726_s0 + $0xc] ss:$16 sm:%s214_s6]  }
   0xd   :  { %v423_v33 = vld [vmem:[%s726_s0 + $0x4] ss:$16 sm:%s180_s12]   ;;  %s275_s17 = smov 3  ;;  %s278_s18 = smov 12  ;;  %v212_v34 = vsel %vm40_vm1, %v428_v30, %v207_v29  ;;  %v424_v37 = vld [vmem:[%s726_s0 - $0x34] ss:$16 sm:%s185_s13]  }
   0xe   :  { %120 = vrot.lane.b32.xlu1 %v119_v23, %s464_s28  ;;  %v183_v36 = vsel %vm35_vm0, %v423_v33, %v422_v31  ;;  %s283_s23 = smov 48  ;;  %v425_v38 = vld [vmem:[%s726_s0 - $0x34] ss:$16 sm:%s190_s15]   ;;  %s250_s25 = smov 3  ;;  %v217_v41 = vsel %vm45_vm2, %v429_v35, %v212_v34  ;;  %vm294_vm10 = vcmask 392448   ;;  %vm343_vm11 = vcmask 261248  }
   0xf   :  { %v438_v39 = vld [vmem:[%s726_s0 + $0x2] ss:$16 sm:%s275_s17]   ;;  %s288_s2 = smov 192  ;;  %s253_s3 = smov 12  ;;  %v188_v42 = vsel %vm40_vm1, %v424_v37, %v183_v36  ;;  %v440_v43 = vld [vmem:[%s726_s0 - $0x36] ss:$16 sm:%s283_s23]  }
  0x10   :  { %71 = vrot.lane.b32.xlu0 %v70_v32, %s465_s16  ;;  %v439_v40 = vld [vmem:[%s726_s0 + $0x2] ss:$16 sm:%s278_s18]   ;;  %s128_s8 = smov 3  ;;  %s131_s13 = smov 12  ;;  %v193_v50 = vsel %vm45_vm2, %v425_v38, %v188_v42 }
  0x11   :  { %v434_v44 = vld [vmem:[%s726_s0 + $0x43] ss:$16 sm:%s250_s25]   ;;  %v414_v46 = vld [vmem:[%s726_s0 + $0x5] ss:$16 sm:%s128_s8]   ;;  %s136_s28 = smov 48  ;;  %v281_v47 = vsel %vm35_vm0, %v439_v40, %v438_v39  ;;  %s258_s14 = smov 48 }
  0x12   :  { %v435_v45 = vld [vmem:[%s726_s0 + $0x43] ss:$16 sm:%s253_s3]   ;;  %v415_v48 = vld [vmem:[%s726_s0 + $0x5] ss:$16 sm:%s131_s13]   ;;  %s141_s20 = smov 192  ;;  %s466_s21 = smov 64   ;;  %v286_v54 = vsel %vm40_vm1, %v440_v43, %v281_v47 }
  0x13   :  { %v416_v49 = vld [vmem:[%s726_s0 - $0x33] ss:$16 sm:%s136_s28]   ;;  %s263_s22 = smov 192  ;;  %v134_v51 = vsel %vm35_vm0, %v415_v48, %v414_v46  ;;  %s348_s24 = smov 3  ;;  %v441_v55 = vld [vmem:[%s726_s0 - $0x36] ss:$16 sm:%s288_s2]   ;;  %v256_v56 = vsel %vm35_vm0, %v435_v45, %v434_v44 }
  0x14   :  { %v417_v52 = vld [vmem:[%s726_s0 - $0x33] ss:$16 sm:%s141_s20]   ;;  %v139_v53 = vsel %vm40_vm1, %v416_v49, %v134_v51  ;;  %s351_s25 = smov 12  ;;  %v436_v57 = vld [vmem:[%s726_s0 + $0xb] ss:$16 sm:%s258_s14]   ;;  %s356_s2 = smov 48  ;;  %v291_v62 = vsel %vm45_vm2, %v441_v55, %v286_v54 }
  0x15   :  { %v144_v58 = vsel %vm45_vm2, %v417_v52, %v139_v53  ;;  %s324_s3 = smov 3  ;;  %v437_v59 = vld [vmem:[%s726_s0 + $0xb] ss:$16 sm:%s263_s22]   ;;  %s467_s6 = smov 80   ;;  %v450_v60 = vld [vmem:[%s726_s0 + $0x41] ss:$16 sm:%s348_s24]   ;;  %v261_v63 = vsel %vm40_vm1, %v436_v57, %v256_v56 }
  0x16   :  { %218 = vrot.lane.b32.xlu1 %v217_v41, %s466_s21  ;;  %145 = vrot.lane.b32.xlu2 %v144_v58, %s467_s6  ;;  %s361_s7 = smov 192  ;;  %s327_s8 = smov 12  ;;  %v451_v61 = vld [vmem:[%s726_s0 + $0x41] ss:$16 sm:%s351_s25]   ;;  %v266_v9 = vsel %vm45_vm2, %v437_v59, %v261_v63 }
  0x17   :  { %s624_s13 = smov 48  ;;  %s152_s28 = smov 3  ;;  %v452_v0 = vld [vmem:[%s726_s0 + $0x9] ss:$16 sm:%s356_s2]   ;;  %v446_v1 = vld [vmem:[%s726_s0 + $0x1] ss:$16 sm:%s324_s3]   ;;  %v354_v5 = vsel %vm35_vm0, %v451_v61, %v450_v60 }
  0x18   :  { %194 = vrot.lane.b32.xlu0 %v193_v50, %s466_s21  ;;  %v447_v2 = vld [vmem:[%s726_s0 + $0x1] ss:$16 sm:%s327_s8]   ;;  %s155_s21 = smov 12  ;;  %s160_s22 = smov 48  ;;  %v359_v15 = vsel %vm40_vm1, %v452_v0, %v354_v5 }
  0x19   :  { %v418_v3 = vld [vmem:[%s726_s0 + $0x45] ss:$16 sm:%s152_s28]   ;;  %s165_s26 = smov 192  ;;  %s226_s27 = smov 3  ;;  %v420_v7 = vld [vmem:[%s726_s0 + $0xd] ss:$16 sm:%s160_s22]   ;;  %v330_v16 = vsel %vm35_vm0, %v447_v2, %v446_v1 }
  0x1a   :  { %v419_v4 = vld [vmem:[%s726_s0 + $0x45] ss:$16 sm:%s155_s21]   ;;  %v421_v8 = vld [vmem:[%s726_s0 + $0xd] ss:$16 sm:%s165_s26]   ;;  %s229_s4 = smov 12  ;;  %s234_s5 = smov 48 }
  0x1b   :  { %v158_v6 = vsel %vm35_vm0, %v419_v4, %v418_v3  ;;  %s468_s8 = smov 32   ;;  %v430_v11 = vld [vmem:[%s726_s0 + $0x3] ss:$16 sm:%s226_s27]   ;;  %v453_v12 = vld [vmem:[%s726_s0 + $0x9] ss:$16 sm:%s361_s7]   ;;  %s239_s19 = smov 192 }
  0x1c   :  { %v163_v10 = vsel %vm40_vm1, %v420_v7, %v158_v6  ;;  %v431_v14 = vld [vmem:[%s726_s0 + $0x3] ss:$16 sm:%s229_s4]   ;;  %v448_v17 = vld [vmem:[%s726_s0 - $0x37] ss:$16 sm:%s624_s13]   ;;  %s337_s13 = smov 192  ;;  %s469_s20 = smov 48   ;;  %v364_v20 = vsel %vm45_vm2, %v453_v12, %v359_v15 }
  0x1d   :  { %v168_v13 = vsel %vm45_vm2, %v421_v8, %v163_v10  ;;  %v232_v18 = vsel %vm35_vm0, %v431_v14, %v430_v11  ;;  %v432_v19 = vld [vmem:[%s726_s0 - $0x35] ss:$16 sm:%s234_s5]   ;;  %s302_s21 = smov 12  ;;  %v335_v21 = vsel %vm40_vm1, %v448_v17, %v330_v16  ;;  %v449_v22 = vld [vmem:[%s726_s0 - $0x37] ss:$16 sm:%s337_s13]   ;;  %s307_s30 = smov 48 }
  0x1e   :  { %292 = vrot.lane.b32.xlu1 %v291_v62, %s468_s8  ;;  %169 = vrot.lane.b32.xlu2 %v168_v13, %s467_s6  ;;  %s299_s6 = smov 3  ;;  %v237_v23 = vsel %vm40_vm1, %v432_v19, %v232_v18  ;;  %v433_v24 = vld [vmem:[%s726_s0 - $0x35] ss:$16 sm:%s239_s19]   ;;  %s470_s2 = smov 16   ;;  %v340_v27 = vsel %vm45_vm2, %v449_v22, %v335_v21 }
  0x1f   :  { %v442_v25 = vld [vmem:[%s726_s0 + $0x42] ss:$16 sm:%s299_s6]   ;;  %v242_v28 = vsel %vm45_vm2, %v433_v24, %v237_v23  ;;  %v444_v30 = vld [vmem:[%s726_s0 + $0xa] ss:$16 sm:%s307_s30]   ;;  %s312_s5 = smov 192 }
  0x20   :  { %267 = vrot.lane.b32.xlu0 %v266_v9, %s469_s20  ;;  %v443_v26 = vld [vmem:[%s726_s0 + $0x42] ss:$16 sm:%s302_s21]   ;;  %v2_v34 = vld [vmem:[%s726_s0] ss:$8 sm:$0xf]  }
  0x21   :  { %v305_v29 = vsel %vm35_vm0, %v443_v26, %v442_v25  ;;  %v445_v32 = vld [vmem:[%s726_s0 + $0xa] ss:$16 sm:%s312_s5]   ;;  %v3_v35 = vld [vmem:[%s726_s0] ss:$8 sm:$0xf0]  }
  0x22   :  { %v310_v31 = vsel %vm40_vm1, %v444_v30, %v305_v29  ;;  %v5_v36 = vsel %vm4_vm3, %v3_v35, %v2_v34  ;;  %v396_v37 = vld [vmem:[%s726_s0 + $0x40] ss:$8 sm:$0xf]  }
  0x23   :  { %v315_v33 = vsel %vm45_vm2, %v445_v32, %v310_v31  ;;  %7 = vst.msk [vmem:[#allocation0] ss:$8 sm:$0x3] %vm6_vm4, %v5_v36   ;;  %v397_v38 = vld [vmem:[%s726_s0 + $0x40] ss:$8 sm:$0xf0]  }
  0x24   :  { %9 = vst.msk [vmem:[#allocation0 - $0xf] ss:$8 sm:$0xc] %vm6_vm4, %v5_v36   ;;  %v19_v39 = vsel %vm4_vm3, %v397_v38, %v396_v37 }
  0x25   :  { %11 = vst.msk [vmem:[#allocation0 - $0x1e] ss:$8 sm:$0x30] %vm6_vm4, %v5_v36  }
  0x26   :  { %365 = vrot.lane.b32.xlu1 %v364_v20, %s470_s2  ;;  %243 = vrot.lane.b32.xlu2 %v242_v28, %s469_s20  ;;  %13 = vst.msk [vmem:[#allocation0 - $0x2d] ss:$8 sm:$0xc0] %vm6_vm4, %v5_v36  }
  0x27   :  { %22 = vst.msk [vmem:[#allocation0 + $0x10] ss:$8 sm:$0x3] %vm6_vm4, %v19_v39  }
  0x28   :  { %341 = vrot.lane.b32.xlu0 %v340_v27, %s470_s2  ;;  %24 = vst.msk [vmem:[#allocation0 + $0x1] ss:$8 sm:$0xc] %vm6_vm4, %v19_v39  }
  0x29   :  { %26 = vst.msk [vmem:[#allocation0 - $0xe] ss:$8 sm:$0x30] %vm6_vm4, %v19_v39  }
  0x2a   :  { %28 = vst.msk [vmem:[#allocation0 - $0x1d] ss:$8 sm:$0xc0] %vm6_vm4, %v19_v39  }
  0x2e   :  { %316 = vrot.lane.b32.xlu2 %v315_v33, %s468_s8 }
  0x70   :  { %v146_v40 = vpop.permute.xlu2 %145  }
  0x78   :  { %v97_v41 = vpop.permute.xlu1 %96   ;;  %v170_v43 = vpop.permute.xlu2 %169  }
  0x7a   :  { %v48_v42 = vpop.permute.xlu0 %47  }
  0x7b   :  { %50 = vst.msk [vmem:[#allocation0] sm:$0xf] %vm49_vm5, %v48_v42  }
  0x7c   :  { %52 = vst.msk [vmem:[#allocation0 + $0x4] sm:$0xf0] %vm49_vm5, %v48_v42  }
  0x7d   :  { %99 = vst.msk [vmem:[#allocation0] sm:$0xf] %vm98_vm6, %v97_v41  }
  0x7e   :  { %101 = vst.msk [vmem:[#allocation0 + $0x4] sm:$0xf0] %vm98_vm6, %v97_v41  }
  0x7f   :  { %148 = vst.msk [vmem:[#allocation0] sm:$0xf] %vm147_vm7, %v146_v40  }
  0x80   :  { %v121_v44 = vpop.permute.xlu1 %120   ;;  %150 = vst.msk [vmem:[#allocation0 + $0x4] sm:$0xf0] %vm147_vm7, %v146_v40   ;;  %v244_v46 = vpop.permute.xlu2 %243  }
  0x82   :  { %v72_v45 = vpop.permute.xlu0 %71  }
  0x83   :  { %75 = vst.msk [vmem:[#allocation0 + $0x10] sm:$0xf] %vm49_vm5, %v72_v45  }
  0x84   :  { %77 = vst.msk [vmem:[#allocation0 + $0x14] sm:$0xf0] %vm49_vm5, %v72_v45  }
  0x85   :  { %124 = vst.msk [vmem:[#allocation0 + $0x10] sm:$0xf] %vm98_vm6, %v121_v44  }
  0x86   :  { %126 = vst.msk [vmem:[#allocation0 + $0x14] sm:$0xf0] %vm98_vm6, %v121_v44  }
  0x87   :  { %173 = vst.msk [vmem:[#allocation0 + $0x10] sm:$0xf] %vm147_vm7, %v170_v43  }
  0x88   :  { %v219_v47 = vpop.permute.xlu1 %218   ;;  %175 = vst.msk [vmem:[#allocation0 + $0x14] sm:$0xf0] %vm147_vm7, %v170_v43   ;;  %v317_v49 = vpop.permute.xlu2 %316  }
  0x89   :  { %222 = vst.msk [vmem:[#allocation0 + $0x10] sm:$0xf] %vm196_vm8, %v219_v47  }
  0x8a   :  { %224 = vst.msk [vmem:[#allocation0 + $0x14] sm:$0xf0] %vm196_vm8, %v219_v47   ;;  %v195_v48 = vpop.permute.xlu0 %194  }
  0x8b   :  { %197 = vst.msk [vmem:[#allocation0] sm:$0xf] %vm196_vm8, %v195_v48  }
  0x8c   :  { %199 = vst.msk [vmem:[#allocation0 + $0x4] sm:$0xf0] %vm196_vm8, %v195_v48  }
  0x8d   :  { %246 = vst.msk [vmem:[#allocation0] sm:$0xf] %vm245_vm9, %v244_v46  }
  0x8e   :  { %248 = vst.msk [vmem:[#allocation0 + $0x4] sm:$0xf0] %vm245_vm9, %v244_v46  }
  0x90   :  { %v293_v50 = vpop.permute.xlu1 %292  }
  0x91   :  { %295 = vst.msk [vmem:[#allocation0] sm:$0xf] %vm294_vm10, %v293_v50  }
  0x92   :  { %297 = vst.msk [vmem:[#allocation0 + $0x4] sm:$0xf0] %vm294_vm10, %v293_v50   ;;  %v268_v51 = vpop.permute.xlu0 %267  }
  0x93   :  { %271 = vst.msk [vmem:[#allocation0 + $0x10] sm:$0xf] %vm245_vm9, %v268_v51  }
  0x94   :  { %273 = vst.msk [vmem:[#allocation0 + $0x14] sm:$0xf0] %vm245_vm9, %v268_v51  }
  0x95   :  { %320 = vst.msk [vmem:[#allocation0 + $0x10] sm:$0xf] %vm294_vm10, %v317_v49  }
  0x96   :  { %322 = vst.msk [vmem:[#allocation0 + $0x14] sm:$0xf0] %vm294_vm10, %v317_v49  }
  0x98   :  { %v366_v52 = vpop.permute.xlu1 %365  }
  0x99   :  { %369 = vst.msk [vmem:[#allocation0 + $0x10] sm:$0xf] %vm343_vm11, %v366_v52  }
  0x9a   :  { %371 = vst.msk [vmem:[#allocation0 + $0x14] sm:$0xf0] %vm343_vm11, %v366_v52   ;;  %v342_v53 = vpop.permute.xlu0 %341  }
  0x9b   :  { %344 = vst.msk [vmem:[#allocation0] sm:$0xf] %vm343_vm11, %v342_v53  }
  0x9c   :  { %346 = vst.msk [vmem:[#allocation0 + $0x4] sm:$0xf0] %vm343_vm11, %v342_v53  }
  0xa0   :  { %v385_v54 = vld [vmem:[#allocation0 + $0x10] sm:$0xf] }
  0xa1   :  { %455 = vst [vmem:[%s727_s1 + $0x8] sm:$0xf] %v385_v54  ;;  %v391_v55 = vld [vmem:[#allocation0 + $0x18] sm:$0xf] }
  0xa2   :  { %456 = vst [vmem:[%s727_s1 + $0xc] sm:$0xf] %v391_v55  ;;  %v374_v56 = vld [vmem:[#allocation0] sm:$0xf] }
  0xa3   :  { %377 = vst [vmem:[%s727_s1] sm:$0xf] %v374_v56  ;;  %v379_v57 = vld [vmem:[#allocation0 + $0x8] sm:$0xf] }
  0xa4   :  { %454 = vst [vmem:[%s727_s1 + $0x4] sm:$0xf] %v379_v57 }

// kernel: mtl_varnet_forward.7
= control target key start
LH: loop header
LB: loop body
LE: loop exit
PB: predicated region body
PF: predicated region fallthrough
CT: control target
= control target key end

     0   :  { %s738_s18 = smov 0   ;;  %s740_s19 = smov 0   ;;  %s801_s0 = inlined_call_operand.vmem [shape: f32[2,4,256], index: 0, kind: input, shape index: {}]   ;;  %s802_s1 = inlined_call_operand.vmem [shape: f32[2,4,256], index: 1, kind: input, shape index: {}]   ;;  %s803_s2 = inlined_call_operand.vmem [shape: f32[2,4,256], index: 2, kind: input, shape index: {}]   ;;  %s804_s3 = inlined_call_operand.vmem [shape: f32[2,4,256], index: 3, kind: input, shape index: {}]   ;;  %s805_s4 = inlined_call_operand.vmem [shape: f32[2,1,256], index: 4, kind: output, shape index: {0}]   ;;  %s806_s5 = inlined_call_operand.vmem [shape: f32[2,1,256], index: 5, kind: output, shape index: {1}]  }
   0x1   :  { %s742_s20 = smov 0  }
   0x2 LB: > { %s28_s21 = sadd.s32 1, %s702_s19  ;;  %p643_p0 = scmp.ge.s32.totalorder %s706_s20, 1  ;;  %s706_s20 = sphi %s742_s20, %s16_s20   ;;  %s702_s19 = sphi %s740_s19, %s810_s19   ;;  %s698_s18 = sphi %s738_s18, %s809_s18  }
   0x3   : > { %p30_p1 = scmp.ge.s32.totalorder %s28_s21, 2  ;;  %p264_p2 = scmp.lt.s32.totalorder %s706_s20, 3 }
   0x5   : > { %s812_s21 = smov (%p30_p1, %s28_s21), 0  ;;  %p265_p3 = pnand %p643_p0, %p264_p2 }
   0x6   : > { %p335_p4 = scmp.lt.s32.totalorder (!%p265_p3), %s698_s18, 1 }
   0x7   : > { %268 = sbr.rel (%p265_p3) target bundleno = 56 (0x38), region = 36 }
   0xc   : > { %s814_s18 = smov (!%p335_p4, %s698_s18), 1  ;;  %vm405_vm0 = vcmask 1043456   ;;  %v426_v24 = vlaneseq  ;;  %vm423_vm1 = vcmask 1040384  }
   0xd   : > { %s656_s22 = sshll.u32 %s814_s18, 3  ;;  %s652_s10 = sshll.u32 %s814_s18, 1 }
   0xe   : > { %s342_s25 = scalar_lea.vmem %s801_s0, %s656_s22  ;;  %s352_s28 = scalar_lea.vmem %s802_s1, %s656_s22  ;;  %vm776_vm2 = vcmp.lt.s32.totalorder %v426_v24, 256 }
   0xf   : > { %s362_s6 = scalar_lea.vmem %s803_s2, %s656_s22  ;;  %s372_s9 = scalar_lea.vmem %s804_s3, %s656_s22  ;;  %v392_v0 = vld [vmem:[%s342_s25] sm:$0xff] }
  0x10   : > { %v393_v1 = vld [vmem:[%s352_s28] sm:$0xff]  ;;  %s381_s13 = scalar_lea.vmem %s805_s4, %s652_s10  ;;  %s390_s16 = scalar_lea.vmem %s806_s5, %s652_s10 }
  0x11   : > { %v394_v2 = vld [vmem:[%s362_s6] sm:$0xff] }
  0x12   : > { %v395_v3 = vld [vmem:[%s372_s9] sm:$0xff]  ;;  %v396_v4 = vmul.f32 %v394_v2, %v392_v0  ;;  %v431_v7 = vmul.f32 %v394_v2, %v393_v1 }
  0x13   : > { %v397_v5 = vmul.f32 %v395_v3, %v393_v1  ;;  %v432_v8 = vmul.f32 %v395_v3, %v392_v0 }
  0x15   : > { %v398_v6 = vadd.f32 %v397_v5, %v396_v4  ;;  %v433_v9 = vsub.f32 %v431_v7, %v432_v8 }
  0x17   : > { %400 = vst [vmem:[#allocation1] ss:$2 sm:$0xff] %v398_v6 }
  0x1e   : > { %v401_v10 = vld.sshfl [vmem:[#allocation1] sm:$0xff pattern:$0x75316420]  ;;  %v402_v11 = vld.sshfl [vmem:[#allocation1 + $0x8] sm:$0xff pattern:$0x75316420] }
  0x1f   : > { %v406_v12 = vsel %vm405_vm0, %v401_v10, 0.0  ;;  %v413_v13 = vsel %vm405_vm0, %v402_v11, 0.0  ;;  %435 = vst [vmem:[#allocation1] ss:$2 sm:$0xff] %v433_v9 }
  0x20   : > { %v407_v14 = vrot.slane %v406_v12, 4  ;;  %v414_v15 = vrot.slane %v413_v13, 4 }
  0x22   : > { %v408_v16 = vadd.f32 %v407_v14, %v406_v12  ;;  %v415_v17 = vadd.f32 %v414_v15, %v413_v13 }
  0x24   : > { %v409_v18 = vrot.slane %v408_v16, 2  ;;  %v416_v19 = vrot.slane %v415_v17, 2 }
  0x26   : > { %v410_v20 = vadd.f32 %v409_v18, %v408_v16  ;;  %v417_v21 = vadd.f32 %v416_v19, %v415_v17  ;;  %v436_v22 = vld.sshfl [vmem:[#allocation1] sm:$0xff pattern:$0x75316420]  ;;  %v437_v23 = vld.sshfl [vmem:[#allocation1 + $0x8] sm:$0xff pattern:$0x75316420] }
  0x27   : > { %v440_v25 = vsel %vm405_vm0, %v436_v22, 0.0  ;;  %v447_v26 = vsel %vm405_vm0, %v437_v23, 0.0 }
  0x28   : > { %v411_v27 = vrot.slane %v410_v20, 1  ;;  %v418_v28 = vrot.slane %v417_v21, 1  ;;  %v441_v29 = vrot.slane %v440_v25, 4  ;;  %v448_v30 = vrot.slane %v447_v26, 4 }
  0x2a   : > { %v419_v31 = vadd.f32 %v418_v28, %v417_v21  ;;  %v442_v32 = vadd.f32 %v441_v29, %v440_v25  ;;  %v449_v33 = vadd.f32 %v448_v30, %v447_v26  ;;  %v412_v35 = vadd.f32 %v411_v27, %v410_v20 }
  0x2c   : > { %v422_v36 = vrot.slane %v419_v31, 7  ;;  %v443_v37 = vrot.slane %v442_v32, 2  ;;  %v450_v38 = vrot.slane %v449_v33, 2 }
  0x2e   : > { %v424_v39 = vsel %vm423_vm1, %v412_v35, %v422_v36  ;;  %v444_v40 = vadd.f32 %v443_v37, %v442_v32  ;;  %v451_v41 = vadd.f32 %v450_v38, %v449_v33 }
  0x2f   : > { %430 = vst.msk [vmem:[%s381_s13] sm:$0x3] %vm776_vm2, %v424_v39 }
  0x30   : > { %v445_v42 = vrot.slane %v444_v40, 1  ;;  %v452_v43 = vrot.slane %v451_v41, 1 }
  0x32   : > { %v453_v44 = vadd.f32 %v452_v43, %v451_v41  ;;  %v446_v45 = vadd.f32 %v445_v42, %v444_v40 }
  0x34   : > { %v456_v46 = vrot.slane %v453_v44, 7 }
  0x36   : > { %v457_v47 = vsel %vm423_vm1, %v446_v45, %v456_v46 }
  0x37   : > { %459 = vst.msk [vmem:[%s390_s16] sm:$0x3] %vm776_vm2, %v457_v47 }
  0x38 PF: > { %s16_s20 = sadd.s32 1, %s706_s20   ;;  %s809_s18 = smov %s702_s19 }
  0x39   : > { %p13_p5 = scmp.ge.s32.totalorder %s16_s20, 4   ;;  %s810_s19 = smov %s812_s21 }
  0x3b   :  { %15 = sbr.rel (!%p13_p5) target bundleno = 2 (0x2), region = 87 }

// kernel: mtl_varnet_forward.8
= control target key start
LH: loop header
LB: loop body
LE: loop exit
PB: predicated region body
PF: predicated region fallthrough
CT: control target
= control target key end

     0   :  { %s1923_s0 = inlined_call_operand.vmem [shape: f32[2,6], index: 0, kind: input, shape index: {}]   ;;  %s1924_s1 = inlined_call_operand.vmem [shape: f32[2,18], index: 1, kind: input, shape index: {}]   ;;  %s1925_s2 = inlined_call_operand.vmem [shape: f32[18], index: 2, kind: input, shape index: {}]   ;;  %s1926_s3 = inlined_call_operand.vmem [shape: f32[18,2], index: 3, kind: input, shape index: {}]   ;;  %s1927_s4 = inlined_call_operand.vmem [shape: f32[2], index: 4, kind: input, shape index: {}]   ;;  %s1928_s5 = inlined_call_operand.vmem [shape: f32[2,8,32], index: 5, kind: input, shape index: {}]   ;;  %s1929_s6 = inlined_call_operand.vmem [shape: f32[2,8,32], index: 6, kind: input, shape index: {}]   ;;  %s1930_s7 = inlined_call_operand.vmem [shape: f32[2,4,8,32], index: 7, kind: input, shape index: {}]   ;;  %s1931_s8 = inlined_call_operand.vmem [shape: f32[2,4,8,32], index: 8, kind: input, shape index: {}]   ;;  %s1932_s9 = inlined_call_operand.vmem [shape: f32[2,4,8,32], index: 9, kind: output, shape index: {0}]   ;;  %s1933_s10 = inlined_call_operand.vmem [shape: f32[2,4,8,32], index: 10, kind: output, shape index: {1}]  }
   0x1   :  { %1934 = sst [smem:[#allocation13_spill]] %s1923_s0 }
   0x2   :  { %16 = vsyncpa [#allocation3], 0 }
   0x3   :  { %17 = vsyncpa [#allocation5], 0 }
   0x4   :  { %18 = vsyncpa [#allocation8], 0  ;;  %s1581_s13 = smov 0   ;;  %s1583_s14 = smov 0  }
   0x5   :  { %s1585_s15 = smov 0  }
   0x6 LB: > { %s336_s18 = sshll.u32 %s1924_s1, 4  ;;  %s1211_s19 = sadd.s32 4294967295, %s1517_s15   ;;  %s1517_s15 = sphi %s1585_s15, %s24_s15   ;;  %s1513_s14 = sphi %s1583_s14, %s1940_s14   ;;  %s1509_s13 = sphi %s1581_s13, %s1939_s13   ;;  %s337_s18 = int_to_ptr.vmem [resolvable:$true] %s336_s18 }
   0x7   : > { %p1213_p0 = scmp.ge.s32.totalorder %s1517_s15, 1  ;;  %p314_p1 = scmp.lt.s32.totalorder %s1517_s15, 3 }
   0x8   : > { %p1602_p2 = scmp.eq.s32.totalorder %s1211_s19, 0  ;;  %s355_s24 = sshll.u32 %s1926_s3, 4  ;;  %s356_s24 = int_to_ptr.vmem [resolvable:$true] %s355_s24 }
   0x9   : > { %p1606_p3 = pnand %p1213_p0, %p314_p1  ;;  %s36_s26 = sadd.s32 1, %s1513_s14 }
   0xa   : > { %s1519_s27 = smov [#allocation4]   ;;  %s1520_s28 = smov [#allocation7]  }
   0xb   : > { %p1351_p4 = pneg %p1606_p3  ;;  %s1521_s29 = smov 128  }
   0xc   : > { %s1522_s30 = smov 8   ;;  %p38_p6 = scmp.ge.s32.totalorder %s36_s26, 2 }
   0xd   : > { %p1617_p5 = pnand %p1602_p2, %p1351_p4  ;;  %s1938_s0 = sld [smem:[#allocation13_spill]] }
   0xe   : > { %s1942_s26 = smov (%p38_p6, %s36_s26), 0  ;;  %s1523_s17 = smov [#allocation2]  }
   0xf   : > { %1357 = dma.vmem_to_smem (!%p1617_p5), %s337_s18, 32, %s1519_s27, [#allocation5]  }
  0x10   : > { %1363 = dma.vmem_to_smem (!%p1617_p5), %s356_s24, 384, %s1520_s28, [#allocation8], %s1521_s29, %s1521_s29, %s1522_s30  }
  0x11   : > { %s346_s18 = sshll.u32 %s1925_s2, 4  ;;  %s368_s24 = sshll.u32 %s1927_s4, 4  ;;  %s347_s18 = int_to_ptr.vmem [resolvable:$true] %s346_s18  ;;  %s369_s24 = int_to_ptr.vmem [resolvable:$true] %s368_s24 }
  0x12   : > { %s1524_s28 = smov [#allocation6]   ;;  %s1525_s29 = smov [#allocation9]  }
  0x13   : > { %s326_s16 = sshll.u32 %s1938_s0, 4  ;;  %423 = sbr.rel (%p1606_p3) target bundleno = 161 (0xa1), region = 56  ;;  %s327_s16 = int_to_ptr.vmem [resolvable:$true] %s326_s16 }
  0x14   : > { %1354 = dma.vmem_to_smem (!%p1617_p5), %s327_s16, 32, %s1523_s17, [#allocation3]  }
  0x15   : > { %1360 = dma.vmem_to_smem (!%p1617_p5), %s347_s18, 16, %s1524_s28, [#allocation5]  }
  0x16   : > { %1366 = dma.vmem_to_smem (!%p1617_p5), %s369_s24, 16, %s1525_s29, [#allocation8]  }
  0x18   : > { %1496 = dma.done.wait (%p1602_p2), [#allocation3], 32  }
  0x19   : > { %1498 = vsyncadd (%p1602_p2), [#allocation3], 4294967264 }
  0x1a   : > { %1500 = dma.done.wait (%p1602_p2), [#allocation5], 48  }
  0x1b   : > { %1502 = vsyncadd (%p1602_p2), [#allocation5], 4294967248 }
  0x1c   : > { %1504 = dma.done.wait (%p1602_p2), [#allocation8], 400  }
  0x1d   : > { %1506 = vsyncadd (%p1602_p2), [#allocation8], 4294966896 }
  0x1e   : > { %450 = sfence }
  0x1f   : > { %p519_p7 = scmp.lt.s32.totalorder %s1509_s13, 1  ;;  %s1659_s21 = sshll.u32 %s1509_s13, 7  ;;  %vm961_vm0 = vcmask 261120  }
  0x20   : > { %s1662_s25 = sld [smem:[#allocation2 + %s1659_s21]]  ;;  %s569_s30 = sadd.s32 1, %s1659_s21 }
  0x21   : > { %s1944_s13 = smov (!%p519_p7, %s1509_s13), 1  ;;  %s1668_s20 = sld [smem:[#allocation2 + %s569_s30]] }
  0x22   : > { %s1226_s11 = sshll.u32 %s1944_s13, 3  ;;  %s571_s12 = sadd.s32 2, %s1659_s21 }
  0x23   : > { %s525_s19 = scalar_lea.vmem %s1928_s5, %s1226_s11  ;;  %s532_s23 = scalar_lea.vmem %s1929_s6, %s1226_s11 }
  0x24   : > { %s572_s27 = sld [smem:[#allocation2 + %s571_s12]]  ;;  %v565_v0 = vld [vmem:[%s525_s19] sm:$0xff]  ;;  %s573_s24 = sadd.s32 3, %s1659_s21 }
  0x25   : > { %v566_v2 = vld [vmem:[%s532_s23] sm:$0xff]  ;;  %s574_s28 = sld [smem:[#allocation2 + %s573_s24]] }
  0x26   : > { %v579_v1 = vstv %s1662_s25  ;;  %s587_s29 = sld [smem:[#allocation4]] }
  0x27   : > { %v583_v3 = vstv %s1668_s20  ;;  %v580_v4 = vsub.f32 %v565_v0, %v579_v1  ;;  %s1237_s30 = sld [smem:[#allocation4 + $0x80]] }
  0x28   : > { %v584_v5 = vsub.f32 %v566_v2, %v583_v3  ;;  %s594_s16 = sld [smem:[#allocation6]] }
  0x29   : > { %s1687_s17 = sld [smem:[#allocation7]] }
  0x2a   : > { %v581_v6 = vstv %s572_s27  ;;  %s1691_s11 = sld [smem:[#allocation7 + $0x1]] }
  0x2b   : > { %v1685_v7 = vmul.f32 %v581_v6, %v580_v4  ;;  %v585_v8 = vstv %s574_s28  ;;  %s1239_s12 = sld [smem:[#allocation4 + $0x1]] }
  0x2c   : > { %v1689_v9 = vmul.f32 %v585_v8, %v584_v5  ;;  %v588_v10 = vstv %s587_s29  ;;  %s1240_s19 = sld [smem:[#allocation4 + $0x81]] }
  0x2d   : > { %v589_v11 = vmul.f32 %v588_v10, %v1685_v7  ;;  %v591_v12 = vstv %s1237_s30  ;;  %s1241_s22 = sld [smem:[#allocation6 + $0x1]] }
  0x2e   : > { %v592_v13 = vmul.f32 %v591_v12, %v1689_v9  ;;  %s1695_s18 = sld [smem:[#allocation7 + $0x80]]  ;;  %v595_v15 = vstv %s594_s16 }
  0x2f   : > { %s1697_s23 = sld [smem:[#allocation7 + $0x81]]  ;;  %v599_v28 = vstv %s1687_s17 }
  0x30   : > { %v593_v14 = vadd.f32 %v592_v13, %v589_v11  ;;  %s1244_s27 = sld [smem:[#allocation4 + $0x2]]  ;;  %v603_v29 = vstv %s1691_s11 }
  0x31   : > { %v607_v16 = vstv %s1239_s12  ;;  %s1245_s24 = sld [smem:[#allocation4 + $0x82]] }
  0x32   : > { %v608_v17 = vmul.f32 %v607_v16, %v1685_v7  ;;  %v610_v18 = vstv %s1240_s19  ;;  %s1700_s28 = sld [smem:[#allocation6 + $0x2]]  ;;  %v596_v19 = vadd.f32 %v595_v15, %v593_v14 }
  0x33   : > { %v611_v20 = vmul.f32 %v610_v18, %v1689_v9  ;;  %s1703_s29 = sld [smem:[#allocation7 + $0x100]]  ;;  %v614_v21 = vstv %s1241_s22 }
  0x34   : > { %s1705_s30 = sld [smem:[#allocation7 + $0x101]]  ;;  %v597_v24 = vmax.f32 %v596_v19, 0.0  ;;  %v618_v30 = vstv %s1695_s18 }
  0x35   : > { %v612_v22 = vadd.f32 %v611_v20, %v608_v17  ;;  %s1249_s16 = sld [smem:[#allocation4 + $0x3]]  ;;  %v622_v33 = vstv %s1697_s23 }
  0x36   : > { %v626_v23 = vstv %s1244_s27  ;;  %s1250_s12 = sld [smem:[#allocation4 + $0x83]]  ;;  %v600_v36 = vmul.f32 %v599_v28, %v597_v24  ;;  %v604_v37 = vmul.f32 %v603_v29, %v597_v24 }
  0x37   : > { %v615_v25 = vadd.f32 %v614_v21, %v612_v22  ;;  %v627_v26 = vmul.f32 %v626_v23, %v1685_v7  ;;  %v629_v27 = vstv %s1245_s24  ;;  %s1708_s19 = sld [smem:[#allocation6 + $0x3]] }
  0x38   : > { %v630_v31 = vmul.f32 %v629_v27, %v1689_v9  ;;  %s1714_s22 = sld [smem:[#allocation7 + $0x180]]  ;;  %v633_v34 = vstv %s1700_s28 }
  0x39   : > { %v616_v32 = vmax.f32 %v615_v25, 0.0  ;;  %s1718_s27 = sld [smem:[#allocation7 + $0x181]]  ;;  %v637_v44 = vstv %s1703_s29 }
  0x3a   : > { %v631_v35 = vadd.f32 %v630_v31, %v627_v26  ;;  %s1254_s0 = sld [smem:[#allocation4 + $0x4]]  ;;  %v641_v47 = vstv %s1705_s30 }
  0x3b   : > { %v619_v38 = vmul.f32 %v618_v30, %v616_v32  ;;  %v645_v39 = vstv %s1249_s16  ;;  %s1255_s17 = sld [smem:[#allocation4 + $0x84]]  ;;  %v623_v40 = vmul.f32 %v622_v33, %v616_v32 }
  0x3c   : > { %v634_v41 = vadd.f32 %v633_v34, %v631_v35  ;;  %v646_v42 = vmul.f32 %v645_v39, %v1685_v7  ;;  %v648_v43 = vstv %s1250_s12  ;;  %s1721_s11 = sld [smem:[#allocation6 + $0x4]] }
  0x3d   : > { %v649_v45 = vmul.f32 %v648_v43, %v1689_v9  ;;  %s1725_s18 = sld [smem:[#allocation7 + $0x200]]  ;;  %v652_v48 = vstv %s1708_s19  ;;  %v620_v50 = vadd.f32 %v619_v38, %v600_v36  ;;  %v624_v51 = vadd.f32 %v623_v40, %v604_v37 }
  0x3e   : > { %v635_v46 = vmax.f32 %v634_v41, 0.0  ;;  %s1729_s23 = sld [smem:[#allocation7 + $0x201]]  ;;  %v656_v58 = vstv %s1714_s22 }
  0x3f   : > { %v650_v49 = vadd.f32 %v649_v45, %v646_v42  ;;  %s1259_s24 = sld [smem:[#allocation4 + $0x5]]  ;;  %v660_v61 = vstv %s1718_s27 }
  0x40   : > { %v638_v52 = vmul.f32 %v637_v44, %v635_v46  ;;  %v664_v53 = vstv %s1254_s0  ;;  %s1260_s28 = sld [smem:[#allocation4 + $0x85]]  ;;  %v642_v54 = vmul.f32 %v641_v47, %v635_v46 }
  0x41   : > { %v653_v55 = vadd.f32 %v652_v48, %v650_v49  ;;  %v665_v56 = vmul.f32 %v664_v53, %v1685_v7  ;;  %v667_v57 = vstv %s1255_s17  ;;  %s1732_s29 = sld [smem:[#allocation6 + $0x5]] }
  0x42   : > { %v668_v59 = vmul.f32 %v667_v57, %v1689_v9  ;;  %s1736_s30 = sld [smem:[#allocation7 + $0x280]]  ;;  %v671_v62 = vstv %s1721_s11  ;;  %v639_v0 = vadd.f32 %v638_v52, %v620_v50  ;;  %v643_v2 = vadd.f32 %v642_v54, %v624_v51 }
  0x43   : > { %v654_v60 = vmax.f32 %v653_v55, 0.0  ;;  %s1740_s16 = sld [smem:[#allocation7 + $0x281]]  ;;  %v675_v12 = vstv %s1725_s18 }
  0x44   : > { %v669_v63 = vadd.f32 %v668_v59, %v665_v56  ;;  %s1264_s0 = sld [smem:[#allocation4 + $0x6]]  ;;  %v679_v15 = vstv %s1729_s23 }
  0x45   : > { %v657_v4 = vmul.f32 %v656_v58, %v654_v60  ;;  %v683_v5 = vstv %s1259_s24  ;;  %s1265_s12 = sld [smem:[#allocation4 + $0x86]]  ;;  %v661_v6 = vmul.f32 %v660_v61, %v654_v60 }
  0x46   : > { %v672_v8 = vadd.f32 %v671_v62, %v669_v63  ;;  %v684_v10 = vmul.f32 %v683_v5, %v1685_v7  ;;  %v686_v11 = vstv %s1260_s28  ;;  %s1743_s19 = sld [smem:[#allocation6 + $0x6]] }
  0x47   : > { %v687_v13 = vmul.f32 %v686_v11, %v1689_v9  ;;  %s1747_s22 = sld [smem:[#allocation7 + $0x300]]  ;;  %v690_v16 = vstv %s1732_s29  ;;  %v658_v18 = vadd.f32 %v657_v4, %v639_v0  ;;  %v662_v19 = vadd.f32 %v661_v6, %v643_v2 }
  0x48   : > { %v673_v14 = vmax.f32 %v672_v8, 0.0  ;;  %s1751_s27 = sld [smem:[#allocation7 + $0x301]]  ;;  %v694_v26 = vstv %s1736_s30 }
  0x49   : > { %v688_v17 = vadd.f32 %v687_v13, %v684_v10  ;;  %s1269_s17 = sld [smem:[#allocation4 + $0x7]]  ;;  %v698_v29 = vstv %s1740_s16 }
  0x4a   : > { %v676_v20 = vmul.f32 %v675_v12, %v673_v14  ;;  %v702_v21 = vstv %s1264_s0  ;;  %s1270_s11 = sld [smem:[#allocation4 + $0x87]]  ;;  %v680_v22 = vmul.f32 %v679_v15, %v673_v14 }
  0x4b   : > { %v691_v23 = vadd.f32 %v690_v16, %v688_v17  ;;  %v703_v24 = vmul.f32 %v702_v21, %v1685_v7  ;;  %v705_v25 = vstv %s1265_s12  ;;  %s1754_s18 = sld [smem:[#allocation6 + $0x7]] }
  0x4c   : > { %v706_v27 = vmul.f32 %v705_v25, %v1689_v9  ;;  %s1758_s23 = sld [smem:[#allocation7 + $0x380]]  ;;  %v709_v30 = vstv %s1743_s19  ;;  %v677_v32 = vadd.f32 %v676_v20, %v658_v18  ;;  %v681_v33 = vadd.f32 %v680_v22, %v662_v19 }
  0x4d   : > { %v692_v28 = vmax.f32 %v691_v23, 0.0  ;;  %s1762_s24 = sld [smem:[#allocation7 + $0x381]]  ;;  %v713_v40 = vstv %s1747_s22 }
  0x4e   : > { %v707_v31 = vadd.f32 %v706_v27, %v703_v24  ;;  %s1274_s28 = sld [smem:[#allocation4 + $0x8]]  ;;  %v717_v43 = vstv %s1751_s27 }
  0x4f   : > { %v695_v34 = vmul.f32 %v694_v26, %v692_v28  ;;  %v721_v35 = vstv %s1269_s17  ;;  %s1275_s29 = sld [smem:[#allocation4 + $0x88]]  ;;  %v699_v36 = vmul.f32 %v698_v29, %v692_v28 }
  0x50   : > { %v710_v37 = vadd.f32 %v709_v30, %v707_v31  ;;  %v722_v38 = vmul.f32 %v721_v35, %v1685_v7  ;;  %v724_v39 = vstv %s1270_s11  ;;  %s1765_s30 = sld [smem:[#allocation6 + $0x8]] }
  0x51   : > { %v725_v41 = vmul.f32 %v724_v39, %v1689_v9  ;;  %s1769_s16 = sld [smem:[#allocation7 + $0x400]]  ;;  %v728_v44 = vstv %s1754_s18  ;;  %v696_v46 = vadd.f32 %v695_v34, %v677_v32  ;;  %v700_v47 = vadd.f32 %v699_v36, %v681_v33 }
  0x52   : > { %v711_v42 = vmax.f32 %v710_v37, 0.0  ;;  %s1773_s0 = sld [smem:[#allocation7 + $0x401]]  ;;  %v732_v54 = vstv %s1758_s23 }
  0x53   : > { %v726_v45 = vadd.f32 %v725_v41, %v722_v38  ;;  %s1279_s12 = sld [smem:[#allocation4 + $0x9]]  ;;  %v736_v57 = vstv %s1762_s24 }
  0x54   : > { %v714_v48 = vmul.f32 %v713_v40, %v711_v42  ;;  %v740_v49 = vstv %s1274_s28  ;;  %s1280_s19 = sld [smem:[#allocation4 + $0x89]]  ;;  %v718_v50 = vmul.f32 %v717_v43, %v711_v42 }
  0x55   : > { %v729_v51 = vadd.f32 %v728_v44, %v726_v45  ;;  %v741_v52 = vmul.f32 %v740_v49, %v1685_v7  ;;  %v743_v53 = vstv %s1275_s29  ;;  %s1776_s22 = sld [smem:[#allocation6 + $0x9]] }
  0x56   : > { %v744_v55 = vmul.f32 %v743_v53, %v1689_v9  ;;  %s1780_s27 = sld [smem:[#allocation7 + $0x480]]  ;;  %v747_v58 = vstv %s1765_s30  ;;  %v715_v60 = vadd.f32 %v714_v48, %v696_v46  ;;  %v719_v61 = vadd.f32 %v718_v50, %v700_v47 }
  0x57   : > { %v730_v56 = vmax.f32 %v729_v51, 0.0  ;;  %s1784_s17 = sld [smem:[#allocation7 + $0x481]]  ;;  %v751_v6 = vstv %s1769_s16 }
  0x58   : > { %v745_v59 = vadd.f32 %v744_v55, %v741_v52  ;;  %s1284_s11 = sld [smem:[#allocation4 + $0xa]]  ;;  %v755_v11 = vstv %s1773_s0 }
  0x59   : > { %v733_v62 = vmul.f32 %v732_v54, %v730_v56  ;;  %v759_v63 = vstv %s1279_s12  ;;  %s1285_s18 = sld [smem:[#allocation4 + $0x8a]]  ;;  %v737_v0 = vmul.f32 %v736_v57, %v730_v56 }
  0x5a   : > { %v748_v2 = vadd.f32 %v747_v58, %v745_v59  ;;  %v760_v4 = vmul.f32 %v759_v63, %v1685_v7  ;;  %v762_v5 = vstv %s1280_s19  ;;  %s1787_s23 = sld [smem:[#allocation6 + $0xa]] }
  0x5b   : > { %v763_v8 = vmul.f32 %v762_v5, %v1689_v9  ;;  %s1791_s24 = sld [smem:[#allocation7 + $0x500]]  ;;  %v766_v12 = vstv %s1776_s22  ;;  %v734_v14 = vadd.f32 %v733_v62, %v715_v60  ;;  %v738_v15 = vadd.f32 %v737_v0, %v719_v61 }
  0x5c   : > { %v749_v10 = vmax.f32 %v748_v2, 0.0  ;;  %s1795_s28 = sld [smem:[#allocation7 + $0x501]]  ;;  %v770_v22 = vstv %s1780_s27 }
  0x5d   : > { %v764_v13 = vadd.f32 %v763_v8, %v760_v4  ;;  %s1289_s29 = sld [smem:[#allocation4 + $0xb]]  ;;  %v774_v25 = vstv %s1784_s17 }
  0x5e   : > { %v752_v16 = vmul.f32 %v751_v6, %v749_v10  ;;  %v778_v17 = vstv %s1284_s11  ;;  %s1290_s30 = sld [smem:[#allocation4 + $0x8b]]  ;;  %v756_v18 = vmul.f32 %v755_v11, %v749_v10 }
  0x5f   : > { %v767_v19 = vadd.f32 %v766_v12, %v764_v13  ;;  %v779_v20 = vmul.f32 %v778_v17, %v1685_v7  ;;  %v781_v21 = vstv %s1285_s18  ;;  %s1798_s16 = sld [smem:[#allocation6 + $0xb]] }
  0x60   : > { %v782_v23 = vmul.f32 %v781_v21, %v1689_v9  ;;  %s1802_s0 = sld [smem:[#allocation7 + $0x580]]  ;;  %v785_v26 = vstv %s1787_s23  ;;  %v753_v28 = vadd.f32 %v752_v16, %v734_v14  ;;  %v757_v29 = vadd.f32 %v756_v18, %v738_v15 }
  0x61   : > { %v768_v24 = vmax.f32 %v767_v19, 0.0  ;;  %s1806_s12 = sld [smem:[#allocation7 + $0x581]]  ;;  %v789_v36 = vstv %s1791_s24 }
  0x62   : > { %v783_v27 = vadd.f32 %v782_v23, %v779_v20  ;;  %s1294_s19 = sld [smem:[#allocation4 + $0xc]]  ;;  %v793_v39 = vstv %s1795_s28 }
  0x63   : > { %v771_v30 = vmul.f32 %v770_v22, %v768_v24  ;;  %v797_v31 = vstv %s1289_s29  ;;  %s1295_s22 = sld [smem:[#allocation4 + $0x8c]]  ;;  %v775_v32 = vmul.f32 %v774_v25, %v768_v24 }
  0x64   : > { %v786_v33 = vadd.f32 %v785_v26, %v783_v27  ;;  %v798_v34 = vmul.f32 %v797_v31, %v1685_v7  ;;  %v800_v35 = vstv %s1290_s30  ;;  %s1809_s27 = sld [smem:[#allocation6 + $0xc]] }
  0x65   : > { %v801_v37 = vmul.f32 %v800_v35, %v1689_v9  ;;  %s1813_s17 = sld [smem:[#allocation7 + $0x600]]  ;;  %v804_v40 = vstv %s1798_s16  ;;  %v772_v42 = vadd.f32 %v771_v30, %v753_v28  ;;  %v776_v43 = vadd.f32 %v775_v32, %v757_v29 }
  0x66   : > { %v787_v38 = vmax.f32 %v786_v33, 0.0  ;;  %s1817_s11 = sld [smem:[#allocation7 + $0x601]]  ;;  %v808_v50 = vstv %s1802_s0 }
  0x67   : > { %v802_v41 = vadd.f32 %v801_v37, %v798_v34  ;;  %s1299_s18 = sld [smem:[#allocation4 + $0xd]]  ;;  %v812_v53 = vstv %s1806_s12 }
  0x68   : > { %v790_v44 = vmul.f32 %v789_v36, %v787_v38  ;;  %v816_v45 = vstv %s1294_s19  ;;  %s1300_s23 = sld [smem:[#allocation4 + $0x8d]]  ;;  %v794_v46 = vmul.f32 %v793_v39, %v787_v38 }
  0x69   : > { %v805_v47 = vadd.f32 %v804_v40, %v802_v41  ;;  %v817_v48 = vmul.f32 %v816_v45, %v1685_v7  ;;  %v819_v49 = vstv %s1295_s22  ;;  %s1820_s24 = sld [smem:[#allocation6 + $0xd]] }
  0x6a   : > { %v820_v51 = vmul.f32 %v819_v49, %v1689_v9  ;;  %s1824_s28 = sld [smem:[#allocation7 + $0x680]]  ;;  %v823_v54 = vstv %s1809_s27  ;;  %v791_v56 = vadd.f32 %v790_v44, %v772_v42  ;;  %v795_v57 = vadd.f32 %v794_v46, %v776_v43 }
  0x6b   : > { %v806_v52 = vmax.f32 %v805_v47, 0.0  ;;  %s1828_s29 = sld [smem:[#allocation7 + $0x681]]  ;;  %v827_v0 = vstv %s1813_s17 }
  0x6c   : > { %v821_v55 = vadd.f32 %v820_v51, %v817_v48  ;;  %s1304_s30 = sld [smem:[#allocation4 + $0xe]]  ;;  %v831_v5 = vstv %s1817_s11 }
  0x6d   : > { %v809_v58 = vmul.f32 %v808_v50, %v806_v52  ;;  %v835_v59 = vstv %s1299_s18  ;;  %s1305_s16 = sld [smem:[#allocation4 + $0x8e]]  ;;  %v813_v60 = vmul.f32 %v812_v53, %v806_v52 }
  0x6e   : > { %v824_v61 = vadd.f32 %v823_v54, %v821_v55  ;;  %v836_v62 = vmul.f32 %v835_v59, %v1685_v7  ;;  %v838_v63 = vstv %s1300_s23  ;;  %s1831_s0 = sld [smem:[#allocation6 + $0xe]] }
  0x6f   : > { %v839_v2 = vmul.f32 %v838_v63, %v1689_v9  ;;  %s1835_s12 = sld [smem:[#allocation7 + $0x700]]  ;;  %v842_v6 = vstv %s1820_s24  ;;  %v810_v10 = vadd.f32 %v809_v58, %v791_v56  ;;  %v814_v11 = vadd.f32 %v813_v60, %v795_v57 }
  0x70   : > { %v825_v4 = vmax.f32 %v824_v61, 0.0  ;;  %s1839_s19 = sld [smem:[#allocation7 + $0x701]]  ;;  %v846_v18 = vstv %s1824_s28 }
  0x71   : > { %v840_v8 = vadd.f32 %v839_v2, %v836_v62  ;;  %s1309_s22 = sld [smem:[#allocation4 + $0xf]]  ;;  %v850_v21 = vstv %s1828_s29 }
  0x72   : > { %v828_v12 = vmul.f32 %v827_v0, %v825_v4  ;;  %v854_v13 = vstv %s1304_s30  ;;  %s1310_s27 = sld [smem:[#allocation4 + $0x8f]]  ;;  %v832_v14 = vmul.f32 %v831_v5, %v825_v4 }
  0x73   : > { %v843_v15 = vadd.f32 %v842_v6, %v840_v8  ;;  %v855_v16 = vmul.f32 %v854_v13, %v1685_v7  ;;  %v857_v17 = vstv %s1305_s16  ;;  %s1842_s17 = sld [smem:[#allocation6 + $0xf]] }
  0x74   : > { %v858_v19 = vmul.f32 %v857_v17, %v1689_v9  ;;  %s1846_s11 = sld [smem:[#allocation7 + $0x780]]  ;;  %v861_v22 = vstv %s1831_s0  ;;  %v829_v24 = vadd.f32 %v828_v12, %v810_v10  ;;  %v833_v25 = vadd.f32 %v832_v14, %v814_v11 }
  0x75   : > { %v844_v20 = vmax.f32 %v843_v15, 0.0  ;;  %s1850_s18 = sld [smem:[#allocation7 + $0x781]]  ;;  %v865_v32 = vstv %s1835_s12 }
  0x76   : > { %v859_v23 = vadd.f32 %v858_v19, %v855_v16  ;;  %s1314_s23 = sld [smem:[#allocation4 + $0x10]]  ;;  %v869_v35 = vstv %s1839_s19 }
  0x77   : > { %v847_v26 = vmul.f32 %v846_v18, %v844_v20  ;;  %v873_v27 = vstv %s1309_s22  ;;  %s1315_s24 = sld [smem:[#allocation4 + $0x90]]  ;;  %v851_v28 = vmul.f32 %v850_v21, %v844_v20 }
  0x78   : > { %v862_v29 = vadd.f32 %v861_v22, %v859_v23  ;;  %v874_v30 = vmul.f32 %v873_v27, %v1685_v7  ;;  %v876_v31 = vstv %s1310_s27  ;;  %s1853_s28 = sld [smem:[#allocation6 + $0x10]]  ;;  %s575_s27 = sadd.s32 4, %s1659_s21 }
  0x79   : > { %v877_v33 = vmul.f32 %v876_v31, %v1689_v9  ;;  %s1857_s29 = sld [smem:[#allocation7 + $0x800]]  ;;  %v880_v36 = vstv %s1842_s17  ;;  %v848_v38 = vadd.f32 %v847_v26, %v829_v24  ;;  %v852_v39 = vadd.f32 %v851_v28, %v833_v25  ;;  %s577_s17 = sadd.s32 5, %s1659_s21 }
  0x7a   : > { %v863_v34 = vmax.f32 %v862_v29, 0.0  ;;  %s1861_s30 = sld [smem:[#allocation7 + $0x801]]  ;;  %v884_v46 = vstv %s1846_s11  ;;  %s1884_s21 = sshll.u32 %s1944_s13, 5 }
  0x7b   : > { %v878_v37 = vadd.f32 %v877_v33, %v874_v30  ;;  %s1319_s16 = sld [smem:[#allocation4 + $0x11]]  ;;  %v888_v47 = vstv %s1850_s18 }
  0x7c   : > { %v866_v40 = vmul.f32 %v865_v32, %v863_v34  ;;  %v892_v41 = vstv %s1314_s23  ;;  %s1320_s0 = sld [smem:[#allocation4 + $0x91]]  ;;  %v870_v42 = vmul.f32 %v869_v35, %v863_v34 }
  0x7d   : > { %v881_v43 = vadd.f32 %v880_v36, %v878_v37  ;;  %v893_v44 = vmul.f32 %v892_v41, %v1685_v7  ;;  %v895_v45 = vstv %s1315_s24  ;;  %s1864_s12 = sld [smem:[#allocation6 + $0x11]] }
  0x7e   : > { %v896_v48 = vmul.f32 %v895_v45, %v1689_v9  ;;  %v899_v50 = vstv %s1853_s28  ;;  %s1870_s19 = sld [smem:[#allocation7 + $0x880]]  ;;  %v867_v51 = vadd.f32 %v866_v40, %v848_v38  ;;  %v871_v53 = vadd.f32 %v870_v42, %v852_v39 }
  0x7f   : > { %v882_v49 = vmax.f32 %v881_v43, 0.0  ;;  %s1872_s22 = sld [smem:[#allocation7 + $0x881]]  ;;  %v903_v60 = vstv %s1857_s29 }
  0x80   : > { %v897_v52 = vadd.f32 %v896_v48, %v893_v44  ;;  %v907_v61 = vstv %s1861_s30  ;;  %s929_s11 = sld [smem:[#allocation9]]  ;;  %s540_s30 = scalar_lea.vmem %s1930_s7, %s1884_s21 }
  0x81   : > { %v885_v54 = vmul.f32 %v884_v46, %v882_v49  ;;  %v889_v55 = vmul.f32 %v888_v47, %v882_v49  ;;  %v911_v56 = vstv %s1319_s16  ;;  %s1324_s18 = sld [smem:[#allocation9 + $0x1]]  ;;  %v941_v26 = vld [vmem:[%s540_s30] sm:$0xff]  ;;  %v942_v28 = vld [vmem:[%s540_s30 + $0x8] sm:$0xff]  ;;  %v943_v30 = vld [vmem:[%s540_s30 + $0x10] sm:$0xff] }
  0x82   : > { %v900_v57 = vadd.f32 %v899_v50, %v897_v52  ;;  %v912_v58 = vmul.f32 %v911_v56, %v1685_v7  ;;  %v914_v59 = vstv %s1320_s0  ;;  %s576_s23 = sld [smem:[#allocation2 + %s575_s27]]  ;;  %v944_v34 = vld [vmem:[%s540_s30 + $0x18] sm:$0xff]  ;;  %s564_s27 = scalar_lea.vmem %s1933_s10, %s1884_s21 }
  0x83   : > { %v915_v62 = vmul.f32 %v914_v59, %v1689_v9  ;;  %v918_v0 = vstv %s1864_s12  ;;  %v886_v2 = vadd.f32 %v885_v54, %v867_v51  ;;  %v890_v4 = vadd.f32 %v889_v55, %v871_v53  ;;  %s578_s24 = sld [smem:[#allocation2 + %s577_s17]]  ;;  %s548_s12 = scalar_lea.vmem %s1931_s8, %s1884_s21 }
  0x84   : > { %v901_v63 = vmax.f32 %v900_v57, 0.0  ;;  %v922_v10 = vstv %s1870_s19  ;;  %v945_v27 = vld [vmem:[%s548_s12] sm:$0xff]  ;;  %v946_v29 = vld [vmem:[%s548_s12 + $0x8] sm:$0xff]  ;;  %v947_v33 = vld [vmem:[%s548_s12 + $0x10] sm:$0xff] }
  0x85   : > { %v916_v5 = vadd.f32 %v915_v62, %v912_v58  ;;  %v926_v11 = vstv %s1872_s22  ;;  %v948_v35 = vld [vmem:[%s548_s12 + $0x18] sm:$0xff]  ;;  %s556_s22 = scalar_lea.vmem %s1932_s9, %s1884_s21 }
  0x86   : > { %v904_v6 = vmul.f32 %v903_v60, %v901_v63  ;;  %v908_v7 = vmul.f32 %v907_v61, %v901_v63  ;;  %v930_v16 = vstv %s929_s11 }
  0x87   : > { %v919_v8 = vadd.f32 %v918_v0, %v916_v5  ;;  %v936_v17 = vstv %s1324_s18 }
  0x88   : > { %v905_v12 = vadd.f32 %v904_v6, %v886_v2  ;;  %v909_v13 = vadd.f32 %v908_v7, %v890_v4  ;;  %v932_v20 = vstv %s576_s23 }
  0x89   : > { %v920_v14 = vmax.f32 %v919_v8, 0.0  ;;  %v938_v21 = vstv %s578_s24 }
  0x8b   : > { %v923_v9 = vmul.f32 %v922_v10, %v920_v14  ;;  %v927_v15 = vmul.f32 %v926_v11, %v920_v14 }
  0x8d   : > { %v924_v18 = vadd.f32 %v923_v9, %v905_v12  ;;  %v928_v19 = vadd.f32 %v927_v15, %v909_v13 }
  0x8f   : > { %v931_v22 = vadd.f32 %v930_v16, %v924_v18  ;;  %v937_v23 = vadd.f32 %v936_v17, %v928_v19 }
  0x91   : > { %v933_v24 = vmul.f32 %v932_v20, %v931_v22  ;;  %v939_v25 = vmul.f32 %v938_v21, %v937_v23 }
  0x93   : > { %v934_v31 = vadd.f32 %v933_v24, %v579_v1  ;;  %v940_v32 = vadd.f32 %v939_v25, %v583_v3 }
  0x95   : > { %v949_v36 = vmul.f32 %v941_v26, %v934_v31  ;;  %v953_v37 = vmul.f32 %v945_v27, %v940_v32  ;;  %v950_v38 = vmul.f32 %v942_v28, %v934_v31  ;;  %v954_v39 = vmul.f32 %v946_v29, %v940_v32 }
  0x96   : > { %v951_v40 = vmul.f32 %v943_v30, %v934_v31  ;;  %v955_v41 = vmul.f32 %v947_v33, %v940_v32  ;;  %v952_v42 = vmul.f32 %v944_v34, %v934_v31  ;;  %v956_v43 = vmul.f32 %v948_v35, %v940_v32 }
  0x97   : > { %v957_v1 = vsub.f32 %v949_v36, %v953_v37  ;;  %v958_v44 = vsub.f32 %v950_v38, %v954_v39  ;;  %v966_v3 = vmul.f32 %v945_v27, %v934_v31  ;;  %v970_v45 = vmul.f32 %v941_v26, %v940_v32 }
  0x98   : > { %v959_v46 = vsub.f32 %v951_v40, %v955_v41  ;;  %v960_v47 = vsub.f32 %v952_v42, %v956_v43  ;;  %v967_v48 = vmul.f32 %v946_v29, %v934_v31  ;;  %v971_v49 = vmul.f32 %v942_v28, %v940_v32 }
  0x99   : > { %962 = vst.msk [vmem:[%s556_s22] sm:$0xff] %vm961_vm0, %v957_v1  ;;  %v974_v50 = vadd.f32 %v970_v45, %v966_v3  ;;  %v968_v51 = vmul.f32 %v947_v33, %v934_v31  ;;  %v972_v52 = vmul.f32 %v943_v30, %v940_v32  ;;  %v969_v53 = vmul.f32 %v948_v35, %v934_v31 }
  0x9a   : > { %963 = vst.msk [vmem:[%s556_s22 + $0x8] sm:$0xff] %vm961_vm0, %v958_v44  ;;  %v975_v54 = vadd.f32 %v971_v49, %v967_v48  ;;  %v973_v55 = vmul.f32 %v944_v34, %v940_v32 }
  0x9b   : > { %964 = vst.msk [vmem:[%s556_s22 + $0x10] sm:$0xff] %vm961_vm0, %v959_v46  ;;  %v976_v56 = vadd.f32 %v972_v52, %v968_v51 }
  0x9c   : > { %965 = vst.msk [vmem:[%s556_s22 + $0x18] sm:$0xff] %vm961_vm0, %v960_v47  ;;  %v977_v57 = vadd.f32 %v973_v55, %v969_v53 }
  0x9d   : > { %978 = vst.msk [vmem:[%s564_s27] sm:$0xff] %vm961_vm0, %v974_v50 }
  0x9e   : > { %979 = vst.msk [vmem:[%s564_s27 + $0x8] sm:$0xff] %vm961_vm0, %v975_v54 }
  0x9f   : > { %980 = vst.msk [vmem:[%s564_s27 + $0x10] sm:$0xff] %vm961_vm0, %v976_v56 }
  0xa0   : > { %981 = vst.msk [vmem:[%s564_s27 + $0x18] sm:$0xff] %vm961_vm0, %v977_v57 }
  0xa1 PF: > { %s24_s15 = sadd.s32 1, %s1517_s15   ;;  %s1939_s13 = smov %s1513_s14 }
  0xa2   : > { %p21_p8 = scmp.ge.s32.totalorder %s24_s15, 4   ;;  %s1940_s14 = smov %s1942_s26 }
  0xa4   :  { %23 = sbr.rel (!%p21_p8) target bundleno = 6 (0x6), region = 128 }
  0xa9   :  { %1031 = vsyncpa [#allocation3], 1 }
  0xaa   :  { %1033 = vsyncpa [#allocation3 + $0x1], 1 }
  0xab   :  { %1034 = vsyncpa [#allocation5], 1 }
  0xac   :  { %1035 = vsyncpa [#allocation8], 1 }

// kernel: mtl_varnet_forward.9
= control target key start
LH: loop header
LB: loop body
LE: loop exit
PB: predicated region body
PF: predicated region fallthrough
CT: control target
= control target key end

     0   :  { %s1038_s11 = smov 0   ;;  %s1040_s12 = smov 0   ;;  %s1104_s0 = inlined_call_operand.<no memory space> [shape: f32[1], index: 0, kind: input, shape index: {}]   ;;  %s1105_s1 = inlined_call_operand.vmem [shape: f32[2,1,256], index: 1, kind: input, shape index: {}]   ;;  %s1106_s2 = inlined_call_operand.vmem [shape: f32[2,4,256], index: 2, kind: input, shape index: {}, may-alias: {2,8}]   ;;  %s1107_s3 = inlined_call_operand.vmem [shape: f32[2,4,256], index: 3, kind: input, shape index: {}, may-alias: {3,9}]   ;;  %s1108_s4 = inlined_call_operand.vmem [shape: f32[2,4,256], index: 4, kind: input, shape index: {}]   ;;  %s1109_s5 = inlined_call_operand.vmem [shape: f32[2,4,256], index: 5, kind: input, shape index: {}]   ;;  %s1110_s6 = inlined_call_operand.vmem [shape: f32[2,4,256], index: 6, kind: input, shape index: {}]   ;;  %s1111_s7 = inlined_call_operand.vmem [shape: f32[2,4,256], index: 7, kind: input, shape index: {}]   ;;  %s1112_s8 = inlined_call_operand.vmem [shape: f32[2,4,256], index: 8, kind: output, shape index: {0}, may-alias: {2,8}]   ;;  %s1113_s9 = inlined_call_operand.vmem [shape: f32[2,4,256], index: 9, kind: output, shape index: {1}, may-alias: {3,9}]  }
   0x1   :  { %15 = sst [smem:[#allocation2]] %s1104_s0  ;;  %s1042_s13 = smov 0  }
   0x2 LB: > { %s33_s0 = sadd.s32 1, %s979_s12  ;;  %p909_p0 = scmp.ge.s32.totalorder %s983_s13, 1  ;;  %s983_s13 = sphi %s1042_s13, %s21_s13   ;;  %s979_s12 = sphi %s1040_s12, %s1115_s12   ;;  %s975_s11 = sphi %s1038_s11, %s1114_s11  }
   0x3   : > { %p35_p1 = scmp.ge.s32.totalorder %s33_s0, 2  ;;  %p415_p2 = scmp.lt.s32.totalorder %s983_s13, 3 }
   0x5   : > { %s1117_s0 = smov (%p35_p1, %s33_s0), 0  ;;  %p416_p3 = pnand %p909_p0, %p415_p2 }
   0x6   : > { %p522_p4 = scmp.lt.s32.totalorder (!%p416_p3), %s975_s11, 1  ;;  %s610_s10 = sld [smem:[#allocation2]] (!%p416_p3) }
   0x7   : > { %419 = sbr.rel (%p416_p3) target bundleno = 47 (0x2f), region = 52 }
   0xc   : > { %s1119_s11 = smov (!%p522_p4, %s975_s11), 1  ;;  %v629_v11 = vstv %s610_s10  ;;  %vm635_vm0 = vcmask 1043456  }
   0xd   : > { %s1056_s14 = sshll.u32 %s1119_s11, 3  ;;  %s910_s15 = sshll.u32 %s1119_s11, 1 }
   0xe   : > { %s538_s18 = scalar_lea.vmem %s1106_s2, %s1056_s14  ;;  %s558_s21 = scalar_lea.vmem %s1108_s4, %s1056_s14 }
   0xf   : > { %v612_v0 = vld [vmem:[%s538_s18] sm:$0xff]  ;;  %s528_s24 = scalar_lea.vmem %s1105_s1, %s910_s15  ;;  %s548_s27 = scalar_lea.vmem %s1107_s3, %s1056_s14 }
  0x10   : > { %v614_v1 = vld [vmem:[%s558_s21] sm:$0xff]  ;;  %s568_s30 = scalar_lea.vmem %s1109_s5, %s1056_s14  ;;  %s578_s16 = scalar_lea.vmem %s1110_s6, %s1056_s14 }
  0x11   : > { %v615_v2 = vsub.f32 %v612_v0, %v614_v1  ;;  %v611_v3 = vld [vmem:[%s528_s24] sm:$0x3]  ;;  %s598_s19 = scalar_lea.vmem %s1112_s8, %s1056_s14  ;;  %s588_s22 = scalar_lea.vmem %s1111_s7, %s1056_s14 }
  0x12   : > { %v613_v4 = vld [vmem:[%s548_s27] sm:$0xff]  ;;  %v617_v6 = vperm.slane %v611_v3, 0  ;;  %v618_v7 = vperm.slane %v611_v3, 1  ;;  %s608_s25 = scalar_lea.vmem %s1113_s9, %s1056_s14 }
  0x13   : > { %622 = vst [vmem:[#allocation1] ss:$2 sm:$0xff] %v615_v2  ;;  %v642_v5 = vld [vmem:[%s568_s30] sm:$0xff] }
  0x14   : > { %v643_v8 = vsub.f32 %v613_v4, %v642_v5  ;;  %v639_v18 = vld [vmem:[%s578_s16] sm:$0xff] }
  0x15   : > { %v660_v29 = vld [vmem:[%s588_s22] sm:$0xff] }
  0x1a   : > { %v623_v9 = vld.sshfl [vmem:[#allocation1] sm:$0xff pattern:$0x75316420]  ;;  %v624_v10 = vld.sshfl [vmem:[#allocation1 + $0x8] sm:$0xff pattern:$0x75316420] }
  0x1b   : > { %v627_v12 = vmul.f32 %v623_v9, %v617_v6  ;;  %v628_v13 = vmul.f32 %v624_v10, %v618_v7  ;;  %645 = vst [vmem:[#allocation1] ss:$2 sm:$0xff] %v643_v8 }
  0x1d   : > { %v631_v14 = vmul.f32 %v629_v11, %v628_v13  ;;  %v630_v15 = vmul.f32 %v629_v11, %v627_v12 }
  0x1f   : > { %v634_v16 = vrot.slane %v631_v14, 4 }
  0x21   : > { %v636_v17 = vsel %vm635_vm0, %v630_v15, %v634_v16 }
  0x22   : > { %v646_v19 = vld.sshfl [vmem:[#allocation1] sm:$0xff pattern:$0x75316420]  ;;  %v647_v20 = vld.sshfl [vmem:[#allocation1 + $0x8] sm:$0xff pattern:$0x75316420]  ;;  %v638_v21 = vsub.f32 %v612_v0, %v636_v17 }
  0x23   : > { %v650_v22 = vmul.f32 %v646_v19, %v617_v6  ;;  %v651_v23 = vmul.f32 %v647_v20, %v618_v7 }
  0x24   : > { %v640_v24 = vsub.f32 %v638_v21, %v639_v18 }
  0x25   : > { %v653_v25 = vmul.f32 %v651_v23, %v629_v11  ;;  %v652_v26 = vmul.f32 %v650_v22, %v629_v11 }
  0x26   : > { %641 = vst [vmem:[%s598_s19] sm:$0xff] %v640_v24 }
  0x27   : > { %v656_v27 = vrot.slane %v653_v25, 4 }
  0x29   : > { %v657_v28 = vsel %vm635_vm0, %v652_v26, %v656_v27 }
  0x2a   : > { %v659_v30 = vsub.f32 %v613_v4, %v657_v28 }
  0x2c   : > { %v661_v31 = vsub.f32 %v659_v30, %v660_v29 }
  0x2e   : > { %662 = vst [vmem:[%s608_s25] sm:$0xff] %v661_v31 }
  0x2f PF: > { %s21_s13 = sadd.s32 1, %s983_s13   ;;  %s1114_s11 = smov %s979_s12 }
  0x30   : > { %p18_p5 = scmp.ge.s32.totalorder %s21_s13, 4   ;;  %s1115_s12 = smov %s1117_s0 }
  0x32   :  { %20 = sbr.rel (!%p18_p5) target bundleno = 2 (0x2), region = 112 }

</bundles_post_ra>
